<compile_context>
chip_gen: v6e
topology: v6e:2x2x1
jax: 0.10.0
libtpu: 0.0.40
codegen_flags: <defaults>
</compile_context>

<pallas_src>
import functools
import math

import jax
import jax.numpy as jnp
from jax.experimental import pallas as pl
from jax.experimental.pallas import tpu as pltpu


# ---------------------------------------------------------------------------
# Kernel
# ---------------------------------------------------------------------------
def _pregated_attention_kernel(
    x1_ref, x2_ref,
    wq_ref, bq_ref, wk_ref, bk_ref, wv_ref, bv_ref,
    q_ref, qhat_ref, attn_ref,
    kT_scratch, v_scratch,
    *, dk: int, matmul_dtype, approx_reciprocal: bool,
):
    t = pl.program_id(1)  # S2-tile index (innermost, "arbitrary")

    def mm(a, b):
        if matmul_dtype is not None:
            a = a.astype(matmul_dtype)
            b = b.astype(matmul_dtype)
        return jnp.dot(a, b, preferred_element_type=jnp.float32)

    # K^T and V are computed once per batch element and stay resident in VMEM
    # scratch (matmul dtype) across all S2 tiles of that batch element.
    @pl.when(t == 0)
    def _():
        x1 = x1_ref[...]                                          # (S1, D1)
        # Module semantics: scores = QK / scale with scale = 1/sqrt(dk), i.e.
        # scores = QK * sqrt(dk).  Fold sqrt(dk) into K here (one S1*dk VPU
        # multiply per batch element) and store K transposed so the per-tile
        # scores matmul is a plain (1,)x(0,) contraction.
        k = (mm(x1, wk_ref[...]) + bk_ref[...]) * jnp.float32(math.sqrt(dk))
        kT_scratch[...] = jnp.transpose(k).astype(kT_scratch.dtype)   # (dk, S1)
        v_scratch[...] = (mm(x1, wv_ref[...]) + bv_ref[...]).astype(v_scratch.dtype)

    # Q projection for this S2 tile (output Q stays UNscaled).
    x2 = x2_ref[...]                                              # (TS2, D2)
    q = mm(x2, wq_ref[...]) + bq_ref[...]                         # (TS2, dk) f32
    q_ref[...] = q.astype(q_ref.dtype)

    q_mm = q.astype(matmul_dtype) if matmul_dtype is not None else q
    scores = jnp.dot(q_mm, kT_scratch[...],
                     preferred_element_type=jnp.float32)          # (TS2, S1)

    # Numerically-stable softmax over S1 (K/V are full along S1).
    m = jnp.max(scores, axis=-1, keepdims=True)
    e = jnp.exp(scores - m)
    denom = jnp.sum(e, axis=-1, keepdims=True)
    if approx_reciprocal:
        # Opt-in only: rows then sum to ~1 within the EUP approximation.
        attn = e * pl.reciprocal(denom, approx=True)
    else:
        attn = e / denom

    # Q_hat = attn @ V
    p = attn.astype(matmul_dtype) if matmul_dtype is not None else attn
    qhat = jnp.dot(p, v_scratch[...], preferred_element_type=jnp.float32)

    qhat_ref[...] = qhat.astype(qhat_ref.dtype)
    attn_ref[...] = attn.astype(attn_ref.dtype)


# ---------------------------------------------------------------------------
# Tiling / VMEM budgeting helpers
# ---------------------------------------------------------------------------
def _round_up(x, m):
    return ((x + m - 1) // m) * m


def _vmem_estimate_bytes(ts2, S1, D1, D2, dk, mm_bytes, attn_bytes,
                         single_buffer_invariants=True):
    """Rough VMEM footprint with (8,128) tile padding."""
    f32 = 4

    def tile(r, c, b=f32):
        return _round_up(max(r, 1), 8) * _round_up(max(c, 1), 128) * b

    # Blocks whose index never changes with the inner grid axis.
    invariant = tile(S1, D1) + tile(D2, dk) + 2 * tile(D1, dk) + 3 * tile(1, dk)
    inv_mult = 1 if single_buffer_invariants else 2
    # Streamed per-tile blocks (x2 in; Q / Q_hat / attn out), double-buffered.
    streamed = tile(ts2, D2) + 2 * tile(ts2, dk) + tile(ts2, S1, attn_bytes)
    # Resident K^T / V scratch (matmul dtype).
    scratch = tile(dk, S1, mm_bytes) + tile(S1, dk, mm_bytes)
    # In-kernel temporaries (scores / exp in f32, q, attn cast for the MXU).
    temps = 2 * tile(ts2, S1) + tile(ts2, dk) + tile(ts2, S1, mm_bytes)
    return inv_mult * invariant + 2 * streamed + scratch + temps


def _vmem_budgets():
    """(tile-selection budget, vmem_limit_bytes clamp) derived from the chip."""
    cap = None
    try:
        info = pltpu.get_tpu_info()
        cap = int(getattr(info, "vmem_capacity_bytes", 0)) or None
    except Exception:
        cap = None
    if cap is None:
        cap = 64 << 20  # conservative (v7x-sized) when the query is unavailable
    if cap <= (64 << 20):
        # v7x: 64 MiB physical VMEM per TC -> leave headroom for compiler scratch.
        return 36 << 20, 56 << 20
    # v5e / v6e: 128 MiB parts -> allow much larger tiles.
    return 96 << 20, 120 << 20


def _pick_s2_tile(S2, S1, D1, D2, dk, budget_bytes, mm_bytes, attn_bytes, cap=1024):
    """Largest S2 tile (preferring multiples of 128) that fits the VMEM budget."""
    def fits(t):
        return _vmem_estimate_bytes(t, S1, D1, D2, dk, mm_bytes, attn_bytes) <= budget_bytes

    if S2 <= 128 and fits(S2):
        return S2
    best = 0
    t = 128
    top = min(cap, _round_up(S2, 128))
    while t <= top:                      # multiples of 128: lane-dense stores,
        if not fits(t):                  # no masked vst on v5e's single store slot
            break
        best = t
        t += 128
    if best == 0:
        t = min(_round_up(S2, 8), 128)
        while t >= 8:
            if fits(t):
                best = t
                break
            t -= 8
    if best == 0:
        # TODO(synk): add an inner S1 (flash-style online-softmax) tiling path
        # for shapes whose full-S1 K/V scratch cannot fit VMEM (matters on v7x).
        raise ValueError(
            "PreGatedAttention: S1/dk too large for the VMEM budget even at the "
            "minimum S2 tile; inner S1 tiling is not implemented.")
    return min(best, S2)


# ---------------------------------------------------------------------------
# Wrapper
# ---------------------------------------------------------------------------
def pregated_attention(x1, x2, params, *, dk: int, ts2=None,
                       matmul_dtype=jnp.bfloat16,
                       attn_dtype=jnp.float32,
                       approx_reciprocal=False):
    """x1: (B, S1, dim1), x2: (B, S2, dim2). Returns (Q, Q_hat, attention_weights).

    matmul_dtype=jnp.bfloat16 (default) casts matmul inputs for MXU throughput
    (f32 accumulation); pass jnp.float32 / None for exact f32 matmuls.
    attn_dtype=jnp.bfloat16 halves the (B,S2,S1) HBM writeback if acceptable.
    """
    wq, bq, wk, bk, wv, bv = params
    B, S1, D1 = x1.shape
    B2, S2, D2 = x2.shape
    assert B == B2, "x1 / x2 batch mismatch"

    mm_bytes = jnp.dtype(matmul_dtype).itemsize if matmul_dtype is not None else 4
    attn_bytes = jnp.dtype(attn_dtype).itemsize
    scratch_dtype = matmul_dtype if matmul_dtype is not None else jnp.float32

    budget, limit_cap = _vmem_budgets()
    if ts2 is None:
        ts2 = _pick_s2_tile(S2, S1, D1, D2, dk, budget, mm_bytes, attn_bytes)
    nt = pl.cdiv(S2, ts2)  # non-divisor tiles OK: last tile is masked

    est = _vmem_estimate_bytes(ts2, S1, D1, D2, dk, mm_bytes, attn_bytes)
    vmem_limit = int(min(max(int(est * 1.25) + (2 << 20), 32 << 20), limit_cap))

    kernel = functools.partial(
        _pregated_attention_kernel, dk=dk, matmul_dtype=matmul_dtype,
        approx_reciprocal=approx_reciprocal)

    out_shapes = (
        jax.ShapeDtypeStruct((B, S2, dk), jnp.float32),   # Q
        jax.ShapeDtypeStruct((B, S2, dk), jnp.float32),   # Q_hat
        jax.ShapeDtypeStruct((B, S2, S1), attn_dtype),    # attention_weights
    )
    # TODO(synk): if dk < 128, pack Q and Q_hat into one lane-dense (B,S2,2*dk)
    # output slab (split in the wrapper) to avoid masked partial stores on v5e.
    out_specs = [
        pl.BlockSpec((None, ts2, dk), lambda b, t: (b, t, 0)),  # Q
        pl.BlockSpec((None, ts2, dk), lambda b, t: (b, t, 0)),  # Q_hat
        pl.BlockSpec((None, ts2, S1), lambda b, t: (b, t, 0)),  # attn
    ]
    scratch_shapes = [
        pltpu.VMEM((dk, S1), scratch_dtype),   # K^T * sqrt(dk), resident across tiles
        pltpu.VMEM((S1, dk), scratch_dtype),   # V, resident across tiles
    ]

    def _run(single_buffer_invariants):
        inv_kwargs = ({"pipeline_mode": pl.Buffered(1)}
                      if single_buffer_invariants else {})
        w2d = lambda shape: pl.BlockSpec(shape, lambda b, t: (0, 0), **inv_kwargs)
        in_specs = [
            # x1 / weights / biases only change with b (or never): single-buffer
            # them so the VMEM goes to a larger S2 tile instead.
            pl.BlockSpec((None, S1, D1), lambda b, t: (b, 0, 0), **inv_kwargs),  # x1
            pl.BlockSpec((None, ts2, D2), lambda b, t: (b, t, 0)),               # x2
            w2d((D2, dk)), w2d((1, dk)),    # Wq, bq
            w2d((D1, dk)), w2d((1, dk)),    # Wk, bk
            w2d((D1, dk)), w2d((1, dk)),    # Wv, bv
        ]
        return pl.pallas_call(
            kernel,
            out_shape=out_shapes,
            grid_spec=pltpu.PrefetchScalarGridSpec(
                num_scalar_prefetch=0,
                grid=(B, nt),
                in_specs=in_specs,
                out_specs=out_specs,
                scratch_shapes=scratch_shapes,
            ),
            compiler_params=pltpu.CompilerParams(
                # Batch axis parallel (megacore); the S2-tile axis must stay
                # "arbitrary" because K^T/V scratch is written at t==0 and
                # reused by later tiles of the same batch element.
                # TODO(synk): when B < #TensorCores (v7x), hoist the K/V
                # projection to a prologue so the S2 axis can also be parallel.
                dimension_semantics=("parallel", "arbitrary"),
                vmem_limit_bytes=vmem_limit,
            ),
        )(x1, x2, wq, bq, wk, bk, wv, bv)

    try:
        return _run(True)
    except Exception:
        # Fallback for environments that reject pipeline_mode=pl.Buffered(1).
        return _run(False)


# ---------------------------------------------------------------------------
# Params / reference / test
# ---------------------------------------------------------------------------
def init_params(key, dim1, dim2, dk):
    """Deterministic xavier-uniform-style init (matches nn.Linear shapes)."""
    kq, kk, kv = jax.random.split(key, 3)

    def xavier(k, fan_in, fan_out):
        bound = math.sqrt(6.0 / (fan_in + fan_out))
        # Stored as (in, out) so forward is x @ W + b (== torch Linear).
        return jax.random.uniform(k, (fan_in, fan_out), jnp.float32, -bound, bound)

    wq = xavier(kq, dim2, dk)
    wk = xavier(kk, dim1, dk)
    wv = xavier(kv, dim1, dk)
    bq = jnp.zeros((1, dk), jnp.float32)
    bk = jnp.zeros((1, dk), jnp.float32)
    bv = jnp.zeros((1, dk), jnp.float32)
    return wq, bq, wk, bk, wv, bv


def reference(x1, x2, params, dk):
    wq, bq, wk, bk, wv, bv = params
    Q = x2 @ wq + bq
    K = x1 @ wk + bk
    V = x1 @ wv + bv
    QK = Q @ jnp.swapaxes(K, -2, -1)
    scores = QK / (1.0 / math.sqrt(dk))     # module semantics: QK * sqrt(dk)
    attn = jax.nn.softmax(scores, axis=-1)
    Qhat = attn @ V
    return Q, Qhat, attn


if __name__ == "__main__":
    B, S1, S2 = 2, 8, 8
    dim1, dim2, dk = 32, 32, 32

    key = jax.random.PRNGKey(0)
    k1, k2, kp = jax.random.split(key, 3)
    x1 = jax.random.normal(k1, (B, S1, dim1), jnp.float32)
    x2 = jax.random.normal(k2, (B, S2, dim2), jnp.float32)
    params = init_params(kp, dim1, dim2, dk)

    Qr, Qhr, ar = reference(x1, x2, params, dk)

    # 1) Exact path (f32 matmul inputs, exact softmax division): strict check.
    Q, Q_hat, attn = pregated_attention(
        x1, x2, params, dk=dk, matmul_dtype=jnp.float32, approx_reciprocal=False)
    jax.block_until_ready((Q, Q_hat, attn))
    assert jnp.allclose(Q, Qr, atol=5e-4, rtol=5e-4)
    assert jnp.allclose(attn, ar, atol=2e-3, rtol=2e-3)
    assert jnp.allclose(Q_hat, Qhr, atol=3e-3, rtol=3e-3)

    # 2) Default fast path (bf16 matmul inputs, f32 accumulation): sanity checks
    #    only — the module's sharp (scores = QK*sqrt(dk)) softmax makes a tight
    #    element-wise comparison against an f32 reference ill-conditioned.
    Qb, Qhb, ab = pregated_attention(x1, x2, params, dk=dk)
    jax.block_until_ready((Qb, Qhb, ab))
    assert Qb.shape == (B, S2, dk) and Qhb.shape == (B, S2, dk) and ab.shape == (B, S2, S1)
    assert bool(jnp.all(jnp.isfinite(Qb)))
    assert bool(jnp.all(jnp.isfinite(Qhb)))
    assert bool(jnp.all(jnp.isfinite(ab)))
    row_sums = jnp.sum(ab.astype(jnp.float32), axis=-1)
    assert bool(jnp.all(jnp.abs(row_sums - 1.0) < 1e-2))       # softmax rows sum to 1
    assert float(jnp.max(jnp.abs(Qb - Qr))) < 0.25             # gross-error guard (bf16)

    print("KERNEL_OK")
</pallas_src>

<mosaic_0001>
module attributes {stable_mosaic.version = 11 : i64} {
  func.func @_pregated_attention_kernel(%arg0: i32, %arg1: i32, %arg2: memref<1x8x32xf32, #tpu.memory_space<vmem>>, %arg3: memref<1x8x32xf32, #tpu.memory_space<vmem>>, %arg4: memref<32x32xf32, #tpu.memory_space<vmem>>, %arg5: memref<1x32xf32, #tpu.memory_space<vmem>>, %arg6: memref<32x32xf32, #tpu.memory_space<vmem>>, %arg7: memref<1x32xf32, #tpu.memory_space<vmem>>, %arg8: memref<32x32xf32, #tpu.memory_space<vmem>>, %arg9: memref<1x32xf32, #tpu.memory_space<vmem>>, %arg10: memref<1x8x32xf32, #tpu.memory_space<vmem>>, %arg11: memref<1x8x32xf32, #tpu.memory_space<vmem>>, %arg12: memref<1x8x8xf32, #tpu.memory_space<vmem>>, %arg13: memref<32x8xf32, #tpu.memory_space<vmem>>, %arg14: memref<8x32xf32, #tpu.memory_space<vmem>>) attributes {dimension_semantics = [#tpu.dimension_semantics<parallel>, #tpu.dimension_semantics<arbitrary>], iteration_bounds = array<i64: 2, 1>, scalar_prefetch = 0 : i64, scratch_operands = 2 : i64, tpu.core_type = #tpu.core_type<tc>, window_params = [{pipeline_mode = #tpu.pipeline_mode<synchronous>, transform_indices = @transform_0, window_bounds = array<i64: 1, 8, 32>}, {transform_indices = @transform_1, window_bounds = array<i64: 1, 8, 32>}, {pipeline_mode = #tpu.pipeline_mode<synchronous>, transform_indices = @transform_2, window_bounds = array<i64: 32, 32>}, {pipeline_mode = #tpu.pipeline_mode<synchronous>, transform_indices = @transform_3, window_bounds = array<i64: 1, 32>}, {pipeline_mode = #tpu.pipeline_mode<synchronous>, transform_indices = @transform_4, window_bounds = array<i64: 32, 32>}, {pipeline_mode = #tpu.pipeline_mode<synchronous>, transform_indices = @transform_5, window_bounds = array<i64: 1, 32>}, {pipeline_mode = #tpu.pipeline_mode<synchronous>, transform_indices = @transform_6, window_bounds = array<i64: 32, 32>}, {pipeline_mode = #tpu.pipeline_mode<synchronous>, transform_indices = @transform_7, window_bounds = array<i64: 1, 32>}, {transform_indices = @transform_8, window_bounds = array<i64: 1, 8, 32>}, {transform_indices = @transform_9, window_bounds = array<i64: 1, 8, 32>}, {transform_indices = @transform_10, window_bounds = array<i64: 1, 8, 8>}]} {
    %c0_i32 = arith.constant 0 : i32
    %0 = arith.cmpi eq, %arg1, %c0_i32 : i32
    %1 = arith.extui %0 : i1 to i32
    %c0_i32_0 = arith.constant 0 : i32
    %2 = arith.cmpi ne, %1, %c0_i32_0 : i32
    scf.if %2 {
      %c0_24 = arith.constant 0 : index
      %c0_25 = arith.constant 0 : index
      %c0_26 = arith.constant 0 : index
      %32 = vector.load %arg2[%c0_24, %c0_25, %c0_26] : memref<1x8x32xf32, #tpu.memory_space<vmem>>, vector<1x8x32xf32>
      %33 = vector.shape_cast %32 : vector<1x8x32xf32> to vector<8x32xf32>
      %c0_27 = arith.constant 0 : index
      %c0_28 = arith.constant 0 : index
      %34 = vector.load %arg6[%c0_27, %c0_28] : memref<32x32xf32, #tpu.memory_space<vmem>>, vector<32x32xf32>
      %cst_29 = arith.constant dense<0.000000e+00> : vector<8x32xf32>
      %35 = tpu.matmul %33, %34, %cst_29 {dimension_numbers = #tpu.dot_dimension_numbers<[1], [0], [0], [1], [0, 0, 1, 1], [], []>} : vector<8x32xf32>, vector<32x32xf32>, vector<8x32xf32> -> vector<8x32xf32>
      %c0_30 = arith.constant 0 : index
      %c0_31 = arith.constant 0 : index
      %36 = vector.load %arg7[%c0_30, %c0_31] : memref<1x32xf32, #tpu.memory_space<vmem>>, vector<1x32xf32>
      %37 = vector.broadcast %36 : vector<1x32xf32> to vector<8x32xf32>
      %38 = arith.addf %35, %37 : vector<8x32xf32>
      %cst_32 = arith.constant 5.65685415 : f32
      %39 = vector.broadcast %cst_32 : f32 to vector<8x32xf32>
      %40 = arith.mulf %38, %39 : vector<8x32xf32>
      %41 = tpu.transpose %40, [1, 0] : vector<8x32xf32> -> vector<32x8xf32>
      %c0_33 = arith.constant 0 : index
      %c0_34 = arith.constant 0 : index
      %42 = vector.load %arg13[%c0_33, %c0_34] : memref<32x8xf32, #tpu.memory_space<vmem>>, vector<32x8xf32>
      tpu.vector_store %arg13[%c0_33, %c0_34], %41 {strides = array<i32>} : memref<32x8xf32, #tpu.memory_space<vmem>>, vector<32x8xf32>,
      %c0_35 = arith.constant 0 : index
      %c0_36 = arith.constant 0 : index
      %43 = vector.load %arg8[%c0_35, %c0_36] : memref<32x32xf32, #tpu.memory_space<vmem>>, vector<32x32xf32>
      %cst_37 = arith.constant dense<0.000000e+00> : vector<8x32xf32>
      %44 = tpu.matmul %33, %43, %cst_37 {dimension_numbers = #tpu.dot_dimension_numbers<[1], [0], [0], [1], [0, 0, 1, 1], [], []>} : vector<8x32xf32>, vector<32x32xf32>, vector<8x32xf32> -> vector<8x32xf32>
      %c0_38 = arith.constant 0 : index
      %c0_39 = arith.constant 0 : index
      %45 = vector.load %arg9[%c0_38, %c0_39] : memref<1x32xf32, #tpu.memory_space<vmem>>, vector<1x32xf32>
      %46 = vector.broadcast %45 : vector<1x32xf32> to vector<8x32xf32>
      %47 = arith.addf %44, %46 : vector<8x32xf32>
      %c0_40 = arith.constant 0 : index
      %c0_41 = arith.constant 0 : index
      %48 = vector.load %arg14[%c0_40, %c0_41] : memref<8x32xf32, #tpu.memory_space<vmem>>, vector<8x32xf32>
      tpu.vector_store %arg14[%c0_40, %c0_41], %47 {strides = array<i32>} : memref<8x32xf32, #tpu.memory_space<vmem>>, vector<8x32xf32>,
    } else {
    }
    %c0 = arith.constant 0 : index
    %c0_1 = arith.constant 0 : index
    %c0_2 = arith.constant 0 : index
    %3 = vector.load %arg3[%c0, %c0_1, %c0_2] : memref<1x8x32xf32, #tpu.memory_space<vmem>>, vector<1x8x32xf32>
    %4 = vector.shape_cast %3 : vector<1x8x32xf32> to vector<8x32xf32>
    %c0_3 = arith.constant 0 : index
    %c0_4 = arith.constant 0 : index
    %5 = vector.load %arg4[%c0_3, %c0_4] : memref<32x32xf32, #tpu.memory_space<vmem>>, vector<32x32xf32>
    %cst = arith.constant dense<0.000000e+00> : vector<8x32xf32>
    %6 = tpu.matmul %4, %5, %cst {dimension_numbers = #tpu.dot_dimension_numbers<[1], [0], [0], [1], [0, 0, 1, 1], [], []>} : vector<8x32xf32>, vector<32x32xf32>, vector<8x32xf32> -> vector<8x32xf32>
    %c0_5 = arith.constant 0 : index
    %c0_6 = arith.constant 0 : index
    %7 = vector.load %arg5[%c0_5, %c0_6] : memref<1x32xf32, #tpu.memory_space<vmem>>, vector<1x32xf32>
    %8 = vector.broadcast %7 : vector<1x32xf32> to vector<8x32xf32>
    %9 = arith.addf %6, %8 : vector<8x32xf32>
    %c0_7 = arith.constant 0 : index
    %c0_8 = arith.constant 0 : index
    %c0_9 = arith.constant 0 : index
    %10 = vector.load %arg10[%c0_7, %c0_8, %c0_9] : memref<1x8x32xf32, #tpu.memory_space<vmem>>, vector<1x8x32xf32>
    %11 = vector.shape_cast %10 : vector<1x8x32xf32> to vector<8x32xf32>
    %12 = vector.shape_cast %9 : vector<8x32xf32> to vector<1x8x32xf32>
    tpu.vector_store %arg10[%c0_7, %c0_8, %c0_9], %12 {strides = array<i32>} : memref<1x8x32xf32, #tpu.memory_space<vmem>>, vector<1x8x32xf32>,
    %c0_10 = arith.constant 0 : index
    %c0_11 = arith.constant 0 : index
    %13 = vector.load %arg13[%c0_10, %c0_11] : memref<32x8xf32, #tpu.memory_space<vmem>>, vector<32x8xf32>
    %cst_12 = arith.constant dense<0.000000e+00> : vector<8x8xf32>
    %14 = tpu.matmul %9, %13, %cst_12 {dimension_numbers = #tpu.dot_dimension_numbers<[1], [0], [0], [1], [0, 0, 1, 1], [], []>} : vector<8x32xf32>, vector<32x8xf32>, vector<8x8xf32> -> vector<8x8xf32>
    %cst_13 = arith.constant dense<0xFF800000> : vector<8xf32>
    %15 = vector.multi_reduction <maximumf>, %14, %cst_13 [1] : vector<8x8xf32> to vector<8xf32>
    %16 = vector.shape_cast %15 : vector<8xf32> to vector<8x1xf32>
    %17 = vector.broadcast %16 : vector<8x1xf32> to vector<8x8xf32>
    %18 = arith.subf %14, %17 : vector<8x8xf32>
    %19 = math.exp %18 : vector<8x8xf32>
    %cst_14 = arith.constant dense<0.000000e+00> : vector<8xf32>
    %20 = vector.multi_reduction <add>, %19, %cst_14 [1] : vector<8x8xf32> to vector<8xf32>
    %21 = vector.shape_cast %20 : vector<8xf32> to vector<8x1xf32>
    %22 = vector.broadcast %21 : vector<8x1xf32> to vector<8x8xf32>
    %23 = arith.divf %19, %22 : vector<8x8xf32>
    %c0_15 = arith.constant 0 : index
    %c0_16 = arith.constant 0 : index
    %24 = vector.load %arg14[%c0_15, %c0_16] : memref<8x32xf32, #tpu.memory_space<vmem>>, vector<8x32xf32>
    %cst_17 = arith.constant dense<0.000000e+00> : vector<8x32xf32>
    %25 = tpu.matmul %23, %24, %cst_17 {dimension_numbers = #tpu.dot_dimension_numbers<[1], [0], [0], [1], [0, 0, 1, 1], [], []>} : vector<8x8xf32>, vector<8x32xf32>, vector<8x32xf32> -> vector<8x32xf32>
    %c0_18 = arith.constant 0 : index
    %c0_19 = arith.constant 0 : index
    %c0_20 = arith.constant 0 : index
    %26 = vector.load %arg11[%c0_18, %c0_19, %c0_20] : memref<1x8x32xf32, #tpu.memory_space<vmem>>, vector<1x8x32xf32>
    %27 = vector.shape_cast %26 : vector<1x8x32xf32> to vector<8x32xf32>
    %28 = vector.shape_cast %25 : vector<8x32xf32> to vector<1x8x32xf32>
    tpu.vector_store %arg11[%c0_18, %c0_19, %c0_20], %28 {strides = array<i32>} : memref<1x8x32xf32, #tpu.memory_space<vmem>>, vector<1x8x32xf32>,
    %c0_21 = arith.constant 0 : index
    %c0_22 = arith.constant 0 : index
    %c0_23 = arith.constant 0 : index
    %29 = vector.load %arg12[%c0_21, %c0_22, %c0_23] : memref<1x8x8xf32, #tpu.memory_space<vmem>>, vector<1x8x8xf32>
    %30 = vector.shape_cast %29 : vector<1x8x8xf32> to vector<8x8xf32>
    %31 = vector.shape_cast %23 : vector<8x8xf32> to vector<1x8x8xf32>
    tpu.vector_store %arg12[%c0_21, %c0_22, %c0_23], %31 {strides = array<i32>} : memref<1x8x8xf32, #tpu.memory_space<vmem>>, vector<1x8x8xf32>,
    return
  }
  func.func @transform_0(%arg0: i32, %arg1: i32) -> (i32, i32, i32) {
    %c0_i32 = arith.constant 0 : i32
    %c0_i32_0 = arith.constant 0 : i32
    %c0_i32_1 = arith.constant 0 : i32
    return %arg0, %c0_i32, %c0_i32_0 : i32, i32, i32
  }
  func.func @transform_1(%arg0: i32, %arg1: i32) -> (i32, i32, i32) {
    %c0_i32 = arith.constant 0 : i32
    %c0_i32_0 = arith.constant 0 : i32
    return %arg0, %arg1, %c0_i32 : i32, i32, i32
  }
  func.func @transform_2(%arg0: i32, %arg1: i32) -> (i32, i32) {
    %c0_i32 = arith.constant 0 : i32
    %c0_i32_0 = arith.constant 0 : i32
    %c0_i32_1 = arith.constant 0 : i32
    return %c0_i32, %c0_i32_0 : i32, i32
  }
  func.func @transform_3(%arg0: i32, %arg1: i32) -> (i32, i32) {
    %c0_i32 = arith.constant 0 : i32
    %c0_i32_0 = arith.constant 0 : i32
    %c0_i32_1 = arith.constant 0 : i32
    return %c0_i32, %c0_i32_0 : i32, i32
  }
  func.func @transform_4(%arg0: i32, %arg1: i32) -> (i32, i32) {
    %c0_i32 = arith.constant 0 : i32
    %c0_i32_0 = arith.constant 0 : i32
    %c0_i32_1 = arith.constant 0 : i32
    return %c0_i32, %c0_i32_0 : i32, i32
  }
  func.func @transform_5(%arg0: i32, %arg1: i32) -> (i32, i32) {
    %c0_i32 = arith.constant 0 : i32
    %c0_i32_0 = arith.constant 0 : i32
    %c0_i32_1 = arith.constant 0 : i32
    return %c0_i32, %c0_i32_0 : i32, i32
  }
  func.func @transform_6(%arg0: i32, %arg1: i32) -> (i32, i32) {
    %c0_i32 = arith.constant 0 : i32
    %c0_i32_0 = arith.constant 0 : i32
    %c0_i32_1 = arith.constant 0 : i32
    return %c0_i32, %c0_i32_0 : i32, i32
  }
  func.func @transform_7(%arg0: i32, %arg1: i32) -> (i32, i32) {
    %c0_i32 = arith.constant 0 : i32
    %c0_i32_0 = arith.constant 0 : i32
    %c0_i32_1 = arith.constant 0 : i32
    return %c0_i32, %c0_i32_0 : i32, i32
  }
  func.func @transform_8(%arg0: i32, %arg1: i32) -> (i32, i32, i32) {
    %c0_i32 = arith.constant 0 : i32
    %c0_i32_0 = arith.constant 0 : i32
    return %arg0, %arg1, %c0_i32 : i32, i32, i32
  }
  func.func @transform_9(%arg0: i32, %arg1: i32) -> (i32, i32, i32) {
    %c0_i32 = arith.constant 0 : i32
    %c0_i32_0 = arith.constant 0 : i32
    return %arg0, %arg1, %c0_i32 : i32, i32, i32
  }
  func.func @transform_10(%arg0: i32, %arg1: i32) -> (i32, i32, i32) {
    %c0_i32 = arith.constant 0 : i32
    %c0_i32_0 = arith.constant 0 : i32
    return %arg0, %arg1, %c0_i32 : i32, i32, i32
  }
}

module attributes {stable_mosaic.version = 11 : i64} {
  func.func @_pregated_attention_kernel(%arg0: i32, %arg1: i32, %arg2: memref<1x8x32xf32, #tpu.memory_space<vmem>>, %arg3: memref<1x8x32xf32, #tpu.memory_space<vmem>>, %arg4: memref<32x32xf32, #tpu.memory_space<vmem>>, %arg5: memref<1x32xf32, #tpu.memory_space<vmem>>, %arg6: memref<32x32xf32, #tpu.memory_space<vmem>>, %arg7: memref<1x32xf32, #tpu.memory_space<vmem>>, %arg8: memref<32x32xf32, #tpu.memory_space<vmem>>, %arg9: memref<1x32xf32, #tpu.memory_space<vmem>>, %arg10: memref<1x8x32xf32, #tpu.memory_space<vmem>>, %arg11: memref<1x8x32xf32, #tpu.memory_space<vmem>>, %arg12: memref<1x8x8xf32, #tpu.memory_space<vmem>>, %arg13: memref<32x8xf32, #tpu.memory_space<vmem>>, %arg14: memref<8x32xf32, #tpu.memory_space<vmem>>) attributes {dimension_semantics = [#tpu.dimension_semantics<parallel>, #tpu.dimension_semantics<arbitrary>], iteration_bounds = array<i64: 2, 1>, scalar_prefetch = 0 : i64, scratch_operands = 2 : i64, tpu.core_type = #tpu.core_type<tc>, window_params = [{transform_indices = @transform_0, window_bounds = array<i64: 1, 8, 32>}, {transform_indices = @transform_1, window_bounds = array<i64: 1, 8, 32>}, {pipeline_mode = #tpu.pipeline_mode<synchronous>, transform_indices = @transform_2, window_bounds = array<i64: 32, 32>}, {pipeline_mode = #tpu.pipeline_mode<synchronous>, transform_indices = @transform_3, window_bounds = array<i64: 1, 32>}, {pipeline_mode = #tpu.pipeline_mode<synchronous>, transform_indices = @transform_4, window_bounds = array<i64: 32, 32>}, {pipeline_mode = #tpu.pipeline_mode<synchronous>, transform_indices = @transform_5, window_bounds = array<i64: 1, 32>}, {pipeline_mode = #tpu.pipeline_mode<synchronous>, transform_indices = @transform_6, window_bounds = array<i64: 32, 32>}, {pipeline_mode = #tpu.pipeline_mode<synchronous>, transform_indices = @transform_7, window_bounds = array<i64: 1, 32>}, {transform_indices = @transform_8, window_bounds = array<i64: 1, 8, 32>}, {transform_indices = @transform_9, window_bounds = array<i64: 1, 8, 32>}, {transform_indices = @transform_10, window_bounds = array<i64: 1, 8, 8>}]} {
    %c0_i32 = arith.constant 0 : i32
    %0 = arith.cmpi eq, %arg1, %c0_i32 : i32
    %1 = arith.extui %0 : i1 to i32
    %c0_i32_0 = arith.constant 0 : i32
    %2 = arith.cmpi ne, %1, %c0_i32_0 : i32
    scf.if %2 {
      %c0_24 = arith.constant 0 : index
      %c0_25 = arith.constant 0 : index
      %c0_26 = arith.constant 0 : index
      %32 = vector.load %arg2[%c0_24, %c0_25, %c0_26] : memref<1x8x32xf32, #tpu.memory_space<vmem>>, vector<1x8x32xf32>
      %33 = vector.shape_cast %32 : vector<1x8x32xf32> to vector<8x32xf32>
      %c0_27 = arith.constant 0 : index
      %c0_28 = arith.constant 0 : index
      %34 = vector.load %arg6[%c0_27, %c0_28] : memref<32x32xf32, #tpu.memory_space<vmem>>, vector<32x32xf32>
      %cst_29 = arith.constant dense<0.000000e+00> : vector<8x32xf32>
      %35 = tpu.matmul %33, %34, %cst_29 {dimension_numbers = #tpu.dot_dimension_numbers<[1], [0], [0], [1], [0, 0, 1, 1], [], []>} : vector<8x32xf32>, vector<32x32xf32>, vector<8x32xf32> -> vector<8x32xf32>
      %c0_30 = arith.constant 0 : index
      %c0_31 = arith.constant 0 : index
      %36 = vector.load %arg7[%c0_30, %c0_31] : memref<1x32xf32, #tpu.memory_space<vmem>>, vector<1x32xf32>
      %37 = vector.broadcast %36 : vector<1x32xf32> to vector<8x32xf32>
      %38 = arith.addf %35, %37 : vector<8x32xf32>
      %cst_32 = arith.constant 5.65685415 : f32
      %39 = vector.broadcast %cst_32 : f32 to vector<8x32xf32>
      %40 = arith.mulf %38, %39 : vector<8x32xf32>
      %41 = tpu.transpose %40, [1, 0] : vector<8x32xf32> -> vector<32x8xf32>
      %c0_33 = arith.constant 0 : index
      %c0_34 = arith.constant 0 : index
      %42 = vector.load %arg13[%c0_33, %c0_34] : memref<32x8xf32, #tpu.memory_space<vmem>>, vector<32x8xf32>
      tpu.vector_store %arg13[%c0_33, %c0_34], %41 {strides = array<i32>} : memref<32x8xf32, #tpu.memory_space<vmem>>, vector<32x8xf32>,
      %c0_35 = arith.constant 0 : index
      %c0_36 = arith.constant 0 : index
      %43 = vector.load %arg8[%c0_35, %c0_36] : memref<32x32xf32, #tpu.memory_space<vmem>>, vector<32x32xf32>
      %cst_37 = arith.constant dense<0.000000e+00> : vector<8x32xf32>
      %44 = tpu.matmul %33, %43, %cst_37 {dimension_numbers = #tpu.dot_dimension_numbers<[1], [0], [0], [1], [0, 0, 1, 1], [], []>} : vector<8x32xf32>, vector<32x32xf32>, vector<8x32xf32> -> vector<8x32xf32>
      %c0_38 = arith.constant 0 : index
      %c0_39 = arith.constant 0 : index
      %45 = vector.load %arg9[%c0_38, %c0_39] : memref<1x32xf32, #tpu.memory_space<vmem>>, vector<1x32xf32>
      %46 = vector.broadcast %45 : vector<1x32xf32> to vector<8x32xf32>
      %47 = arith.addf %44, %46 : vector<8x32xf32>
      %c0_40 = arith.constant 0 : index
      %c0_41 = arith.constant 0 : index
      %48 = vector.load %arg14[%c0_40, %c0_41] : memref<8x32xf32, #tpu.memory_space<vmem>>, vector<8x32xf32>
      tpu.vector_store %arg14[%c0_40, %c0_41], %47 {strides = array<i32>} : memref<8x32xf32, #tpu.memory_space<vmem>>, vector<8x32xf32>,
    } else {
    }
    %c0 = arith.constant 0 : index
    %c0_1 = arith.constant 0 : index
    %c0_2 = arith.constant 0 : index
    %3 = vector.load %arg3[%c0, %c0_1, %c0_2] : memref<1x8x32xf32, #tpu.memory_space<vmem>>, vector<1x8x32xf32>
    %4 = vector.shape_cast %3 : vector<1x8x32xf32> to vector<8x32xf32>
    %c0_3 = arith.constant 0 : index
    %c0_4 = arith.constant 0 : index
    %5 = vector.load %arg4[%c0_3, %c0_4] : memref<32x32xf32, #tpu.memory_space<vmem>>, vector<32x32xf32>
    %cst = arith.constant dense<0.000000e+00> : vector<8x32xf32>
    %6 = tpu.matmul %4, %5, %cst {dimension_numbers = #tpu.dot_dimension_numbers<[1], [0], [0], [1], [0, 0, 1, 1], [], []>} : vector<8x32xf32>, vector<32x32xf32>, vector<8x32xf32> -> vector<8x32xf32>
    %c0_5 = arith.constant 0 : index
    %c0_6 = arith.constant 0 : index
    %7 = vector.load %arg5[%c0_5, %c0_6] : memref<1x32xf32, #tpu.memory_space<vmem>>, vector<1x32xf32>
    %8 = vector.broadcast %7 : vector<1x32xf32> to vector<8x32xf32>
    %9 = arith.addf %6, %8 : vector<8x32xf32>
    %c0_7 = arith.constant 0 : index
    %c0_8 = arith.constant 0 : index
    %c0_9 = arith.constant 0 : index
    %10 = vector.load %arg10[%c0_7, %c0_8, %c0_9] : memref<1x8x32xf32, #tpu.memory_space<vmem>>, vector<1x8x32xf32>
    %11 = vector.shape_cast %10 : vector<1x8x32xf32> to vector<8x32xf32>
    %12 = vector.shape_cast %9 : vector<8x32xf32> to vector<1x8x32xf32>
    tpu.vector_store %arg10[%c0_7, %c0_8, %c0_9], %12 {strides = array<i32>} : memref<1x8x32xf32, #tpu.memory_space<vmem>>, vector<1x8x32xf32>,
    %c0_10 = arith.constant 0 : index
    %c0_11 = arith.constant 0 : index
    %13 = vector.load %arg13[%c0_10, %c0_11] : memref<32x8xf32, #tpu.memory_space<vmem>>, vector<32x8xf32>
    %cst_12 = arith.constant dense<0.000000e+00> : vector<8x8xf32>
    %14 = tpu.matmul %9, %13, %cst_12 {dimension_numbers = #tpu.dot_dimension_numbers<[1], [0], [0], [1], [0, 0, 1, 1], [], []>} : vector<8x32xf32>, vector<32x8xf32>, vector<8x8xf32> -> vector<8x8xf32>
    %cst_13 = arith.constant dense<0xFF800000> : vector<8xf32>
    %15 = vector.multi_reduction <maximumf>, %14, %cst_13 [1] : vector<8x8xf32> to vector<8xf32>
    %16 = vector.shape_cast %15 : vector<8xf32> to vector<8x1xf32>
    %17 = vector.broadcast %16 : vector<8x1xf32> to vector<8x8xf32>
    %18 = arith.subf %14, %17 : vector<8x8xf32>
    %19 = math.exp %18 : vector<8x8xf32>
    %cst_14 = arith.constant dense<0.000000e+00> : vector<8xf32>
    %20 = vector.multi_reduction <add>, %19, %cst_14 [1] : vector<8x8xf32> to vector<8xf32>
    %21 = vector.shape_cast %20 : vector<8xf32> to vector<8x1xf32>
    %22 = vector.broadcast %21 : vector<8x1xf32> to vector<8x8xf32>
    %23 = arith.divf %19, %22 : vector<8x8xf32>
    %c0_15 = arith.constant 0 : index
    %c0_16 = arith.constant 0 : index
    %24 = vector.load %arg14[%c0_15, %c0_16] : memref<8x32xf32, #tpu.memory_space<vmem>>, vector<8x32xf32>
    %cst_17 = arith.constant dense<0.000000e+00> : vector<8x32xf32>
    %25 = tpu.matmul %23, %24, %cst_17 {dimension_numbers = #tpu.dot_dimension_numbers<[1], [0], [0], [1], [0, 0, 1, 1], [], []>} : vector<8x8xf32>, vector<8x32xf32>, vector<8x32xf32> -> vector<8x32xf32>
    %c0_18 = arith.constant 0 : index
    %c0_19 = arith.constant 0 : index
    %c0_20 = arith.constant 0 : index
    %26 = vector.load %arg11[%c0_18, %c0_19, %c0_20] : memref<1x8x32xf32, #tpu.memory_space<vmem>>, vector<1x8x32xf32>
    %27 = vector.shape_cast %26 : vector<1x8x32xf32> to vector<8x32xf32>
    %28 = vector.shape_cast %25 : vector<8x32xf32> to vector<1x8x32xf32>
    tpu.vector_store %arg11[%c0_18, %c0_19, %c0_20], %28 {strides = array<i32>} : memref<1x8x32xf32, #tpu.memory_space<vmem>>, vector<1x8x32xf32>,
    %c0_21 = arith.constant 0 : index
    %c0_22 = arith.constant 0 : index
    %c0_23 = arith.constant 0 : index
    %29 = vector.load %arg12[%c0_21, %c0_22, %c0_23] : memref<1x8x8xf32, #tpu.memory_space<vmem>>, vector<1x8x8xf32>
    %30 = vector.shape_cast %29 : vector<1x8x8xf32> to vector<8x8xf32>
    %31 = vector.shape_cast %23 : vector<8x8xf32> to vector<1x8x8xf32>
    tpu.vector_store %arg12[%c0_21, %c0_22, %c0_23], %31 {strides = array<i32>} : memref<1x8x8xf32, #tpu.memory_space<vmem>>, vector<1x8x8xf32>,
    return
  }
  func.func @transform_0(%arg0: i32, %arg1: i32) -> (i32, i32, i32) {
    %c0_i32 = arith.constant 0 : i32
    %c0_i32_0 = arith.constant 0 : i32
    %c0_i32_1 = arith.constant 0 : i32
    return %arg0, %c0_i32, %c0_i32_0 : i32, i32, i32
  }
  func.func @transform_1(%arg0: i32, %arg1: i32) -> (i32, i32, i32) {
    %c0_i32 = arith.constant 0 : i32
    %c0_i32_0 = arith.constant 0 : i32
    return %arg0, %arg1, %c0_i32 : i32, i32, i32
  }
  func.func @transform_2(%arg0: i32, %arg1: i32) -> (i32, i32) {
    %c0_i32 = arith.constant 0 : i32
    %c0_i32_0 = arith.constant 0 : i32
    %c0_i32_1 = arith.constant 0 : i32
    return %c0_i32, %c0_i32_0 : i32, i32
  }
  func.func @transform_3(%arg0: i32, %arg1: i32) -> (i32, i32) {
    %c0_i32 = arith.constant 0 : i32
    %c0_i32_0 = arith.constant 0 : i32
    %c0_i32_1 = arith.constant 0 : i32
    return %c0_i32, %c0_i32_0 : i32, i32
  }
  func.func @transform_4(%arg0: i32, %arg1: i32) -> (i32, i32) {
    %c0_i32 = arith.constant 0 : i32
    %c0_i32_0 = arith.constant 0 : i32
    %c0_i32_1 = arith.constant 0 : i32
    return %c0_i32, %c0_i32_0 : i32, i32
  }
  func.func @transform_5(%arg0: i32, %arg1: i32) -> (i32, i32) {
    %c0_i32 = arith.constant 0 : i32
    %c0_i32_0 = arith.constant 0 : i32
    %c0_i32_1 = arith.constant 0 : i32
    return %c0_i32, %c0_i32_0 : i32, i32
  }
  func.func @transform_6(%arg0: i32, %arg1: i32) -> (i32, i32) {
    %c0_i32 = arith.constant 0 : i32
    %c0_i32_0 = arith.constant 0 : i32
    %c0_i32_1 = arith.constant 0 : i32
    return %c0_i32, %c0_i32_0 : i32, i32
  }
  func.func @transform_7(%arg0: i32, %arg1: i32) -> (i32, i32) {
    %c0_i32 = arith.constant 0 : i32
    %c0_i32_0 = arith.constant 0 : i32
    %c0_i32_1 = arith.constant 0 : i32
    return %c0_i32, %c0_i32_0 : i32, i32
  }
  func.func @transform_8(%arg0: i32, %arg1: i32) -> (i32, i32, i32) {
    %c0_i32 = arith.constant 0 : i32
    %c0_i32_0 = arith.constant 0 : i32
    return %arg0, %arg1, %c0_i32 : i32, i32, i32
  }
  func.func @transform_9(%arg0: i32, %arg1: i32) -> (i32, i32, i32) {
    %c0_i32 = arith.constant 0 : i32
    %c0_i32_0 = arith.constant 0 : i32
    return %arg0, %arg1, %c0_i32 : i32, i32, i32
  }
  func.func @transform_10(%arg0: i32, %arg1: i32) -> (i32, i32, i32) {
    %c0_i32 = arith.constant 0 : i32
    %c0_i32_0 = arith.constant 0 : i32
    return %arg0, %arg1, %c0_i32 : i32, i32, i32
  }
}

</mosaic_0001>

<bundles_post_ra>
// kernel: tpu_custom_call.1
= control target key start
LH: loop header
LB: loop body
LE: loop exit
PB: predicated region body
PF: predicated region fallthrough
CT: control target
= control target key end

     0   :  { %s2114_s0 = inlined_call_operand.hbm [shape: f32[2,8,32], index: 0, kind: input, shape index: {}]   ;;  %s2115_s1 = inlined_call_operand.hbm [shape: f32[2,8,32], index: 1, kind: input, shape index: {}]   ;;  %s2116_s2 = inlined_call_operand.hbm [shape: f32[32,32], index: 2, kind: input, shape index: {}]   ;;  %s2117_s3 = inlined_call_operand.vmem [shape: f32[1,32], index: 3, kind: input, shape index: {}]   ;;  %s2118_s4 = inlined_call_operand.hbm [shape: f32[32,32], index: 4, kind: input, shape index: {}]   ;;  %s2119_s5 = inlined_call_operand.vmem [shape: f32[1,32], index: 5, kind: input, shape index: {}]   ;;  %s2120_s6 = inlined_call_operand.hbm [shape: f32[32,32], index: 6, kind: input, shape index: {}]   ;;  %s2121_s7 = inlined_call_operand.vmem [shape: f32[1,32], index: 7, kind: input, shape index: {}]   ;;  %s2122_s8 = inlined_call_operand.hbm [shape: f32[2,8,32], index: 8, kind: output, shape index: {0}]   ;;  %s2123_s9 = inlined_call_operand.hbm [shape: f32[2,8,32], index: 9, kind: output, shape index: {1}]   ;;  %s2124_s10 = inlined_call_operand.hbm [shape: f32[2,8,8], index: 10, kind: output, shape index: {2}]  }
   0x1   :  { %2139 = sst [smem:[#allocation25_spill]] %s2114_s0 }
   0x2   :  { %2140 = sst [smem:[#allocation26_spill]] %s2116_s2 }
   0x3   :  { %2141 = sst [smem:[#allocation27_spill]] %s2118_s4 }
   0x4   :  { %2142 = sst [smem:[#allocation28_spill]] %s2120_s6 }
   0x5   :  { %16 = vsyncpa [#allocation5], 0 }
   0x6   :  { %17 = vsyncpa [#allocation8], 0 }
   0x7   :  { %19 = vsyncpa [#allocation8 + $0x1], 0 }
   0x8   :  { %20 = vsyncpa [#allocation11], 0 }
   0x9   :  { %21 = vsyncpa [#allocation6], 0 }
   0xa   :  { %23 = vsyncpa [#allocation6 + $0x1], 0 }
   0xb   :  { %24 = vsyncpa [#allocation15], 0 }
   0xc   :  { %26 = vsyncpa [#allocation15 + $0x1], 0  ;;  %s1750_s13 = smov 0   ;;  %s1752_s14 = smov 0  }
   0xd   :  { %s1754_s15 = smov 0   ;;  %s1756_s16 = smov 0  }
   0xe   :  { %s1758_s17 = smov 0   ;;  %s1760_s18 = smov 0  }
   0xf LB: > { %2143 = sst [smem:[#allocation23_spill]] %s1661_s13  ;;  %s1683_s19 = smov [#allocation9]   ;;  %s1681_s18 = sphi %s1760_s18, %s32_s18   ;;  %s1677_s17 = sphi %s1758_s17, %s2179_s17   ;;  %s1673_s16 = sphi %s1756_s16, %s2178_s16   ;;  %s1669_s15 = sphi %s1754_s15, %s2177_s15   ;;  %s1665_s14 = sphi %s1752_s14, %s2176_s14   ;;  %s1661_s13 = sphi %s1750_s13, %s2175_s13  }
  0x10   : > { %s338_s20 = sshll.u32 %s1683_s19, 4  ;;  %s1781_s21 = sadd.s32 4294967295, %s1681_s18   ;;  %s339_s20 = int_to_ptr.vmem [resolvable:$true] %s338_s20 }
  0x11   : > { %p1179_p0 = scmp.ge.s32.totalorder %s1681_s18, 1  ;;  %p2129_p1 = scmp.eq.s32.totalorder %s1781_s21, 0 }
  0x12   : > { %p313_p2 = scmp.lt.s32.totalorder %s1681_s18, 3  ;;  %s1684_s23 = smov [#allocation10]  }
  0x13   : > { %s354_s24 = sshll.u32 %s1684_s23, 4  ;;  %s1410_s26 = scalar_lea.vmem %s339_s20, 512  ;;  %s355_s24 = int_to_ptr.vmem [resolvable:$true] %s354_s24 }
  0x14   : > { %p1786_p3 = pnand %p1179_p0, %p313_p2  ;;  %p1411_p8 = scmp.ne.s32.totalorder %s339_s20, %s1410_s26 }
  0x15   : > { %p1418_p11 = scmp.lt.s32.totalorder %s339_s20, %s339_s20  ;;  %p1419_p12 = scmp.lt.s32.totalorder %s1410_s26, %s1410_s26 }
  0x16   : > { %s2144_s22 = scalar_select %p1786_p3, 1, 0 }
  0x17   : > { %p1304_p5 = pneg %p1786_p3  ;;  %p1420_p13 = por %p1419_p12, %p1418_p11 }
  0x19   : > { %p1798_p6 = pnand %p1304_p5, %p2129_p1 }
  0x1b   : > { %s2145_s25 = scalar_select %p1798_p6, 1, 0 }
  0x1c   : > { %p2130_p7 = pneg %p1798_p6 }
  0x1e   : > { %p1413_p9 = pnand %p1411_p8, %p2130_p7 }
  0x20   : > { %p1414_p10 = pneg %p1413_p9 }
  0x22   : > { %p1421_p0 = pnand %p1420_p13, %p1414_p10 }
  0x24   : > { %1424 = shalt.err (!%p1421_p0)
}
  0x25   : > { %s2126_s27 = smov 128   ;;  %s2127_s28 = smov 8  }
  0x26   : > { %s2146_s2 = sld [smem:[#allocation26_spill]]  ;;  %s1436_s11 = scalar_lea.vmem %s355_s24, 512 }
  0x27   : > { %p1437_p2 = scmp.ne.s32.totalorder %s355_s24, %s1436_s11  ;;  %p1444_p10 = scmp.lt.s32.totalorder %s355_s24, %s355_s24 }
  0x28   : > { %p1445_p11 = scmp.lt.s32.totalorder %s1436_s11, %s1436_s11 }
  0x29   : > { %p1439_p8 = pnand %p1437_p2, %p2130_p7 }
  0x2a   : > { %p1446_p12 = por %p1445_p11, %p1444_p10 }
  0x2b   : > { %p1440_p9 = pneg %p1439_p8 }
  0x2c   : > { %1310 = dma.hbm_to_vmem [thread:$0]  (!%p1798_p6), %s2146_s2, 512, %s339_s20, [#allocation8], %s2126_s27, %s2126_s27, %s2127_s28  }
  0x2d   : > { %p1447_p13 = pnand %p1446_p12, %p1440_p9 }
  0x2f   : > { %1450 = shalt.err (!%p1447_p13)
}
  0x30   : > { %s2147_s4 = sld [smem:[#allocation27_spill]]  ;;  %s2125_s20 = sadd.s32 4294967294, %s1681_s18  }
  0x31   : > { %p64_p0 = scmp.ne.s32.totalorder %s1665_s14, %s1661_s13  ;;  %p86_p2 = scmp.ne.s32.totalorder %s1669_s15, %s1665_s14 }
  0x32   : > { %p87_p8 = scmp.eq.s32.totalorder %s1681_s18, 0  ;;  %p244_p10 = scmp.eq.s32.totalorder %s1781_s21, 1 }
  0x33   : > { %p1834_p9 = por %p2129_p1, %p64_p0  ;;  %p250_p12 = scmp.eq.s32.totalorder %s2125_s20, 1 }
  0x34   : > { %p1839_p11 = por %p87_p8, %p86_p2  ;;  %p1845_p13 = por %p244_p10, %p86_p2 }
  0x35   : > { %s2148_s23 = scalar_select %p1834_p9, 1, 0 }
  0x36   : > { %1313 = dma.hbm_to_vmem [thread:$0]  (!%p1798_p6), %s2147_s4, 512, %s355_s24, [#allocation11], %s2126_s27, %s2126_s27, %s2127_s28  }
  0x37   : > { %s2149_s26 = scalar_select %p1839_p11, 1, 0 }
  0x38   : > { %s2150_s29 = scalar_select %p1845_p13, 1, 0 }
  0x39   : > { %s1850_s24 = sshll.u32 %s1673_s16, 7  ;;  %p1852_p4 = por %p250_p12, %p64_p0 }
  0x3a   : > { %s2153_s0 = sld [smem:[#allocation25_spill]]  ;;  %p1865_p8 = pnand %p1304_p5, %p1834_p9 }
  0x3b   : > { %s2151_s30 = scalar_select %p1852_p4, 1, 0 }
  0x3c   : > { %s1687_s27 = smov [#allocation4]   ;;  %p1453_p2 = pneg %p1865_p8 }
  0x3d   : > { %2152 = sst [smem:[#allocation24_spill]] %s2151_s30  ;;  %s328_s16 = sshll.u32 %s1687_s27, 4  ;;  %s329_s16 = int_to_ptr.vmem [resolvable:$true] %s328_s16 }
  0x40   : > { %s326_s19 = scalar_lea.hbm %s2153_s0, %s1850_s24  ;;  %s1456_s12 = scalar_lea.hbm %s2153_s0, 256 }
  0x41   : > { %s1451_s28 = scalar_lea.hbm %s326_s19, 128  ;;  %p1457_p5 = scmp.lt.s32.totalorder %s326_s19, %s2153_s0 }
  0x42   : > { %p1452_p0 = scmp.ne.s32.totalorder %s326_s19, %s1451_s28  ;;  %p1458_p1 = scmp.lt.s32.totalorder %s1456_s12, %s1451_s28 }
  0x44   : > { %p1454_p10 = pnand %p1453_p2, %p1452_p0  ;;  %p1459_p7 = por %p1458_p1, %p1457_p5 }
  0x46   : > { %p1455_p12 = pneg %p1454_p10 }
  0x48   : > { %p1460_p4 = pnand %p1459_p7, %p1455_p12 }
  0x4a   : > { %1463 = shalt.err (!%p1460_p4)
}
  0x4b   : > { %s1464_s27 = scalar_lea.vmem %s329_s16, 128  ;;  %p1472_p11 = scmp.lt.s32.totalorder %s329_s16, %s329_s16 }
  0x4c   : > { %p1465_p13 = scmp.ne.s32.totalorder %s329_s16, %s1464_s27  ;;  %p1473_p6 = scmp.lt.s32.totalorder %s1464_s27, %s1464_s27 }
  0x4e   : > { %p1467_p9 = pnand %p1465_p13, %p1453_p2  ;;  %p1474_p0 = por %p1473_p6, %p1472_p11 }
  0x50   : > { %p1468_p3 = pneg %p1467_p9 }
  0x52   : > { %p1475_p10 = pnand %p1474_p0, %p1468_p3 }
  0x54   : > { %1478 = shalt.err (!%p1475_p10)
}
  0x55   : > { %1307 = dma.hbm_to_vmem [thread:$0]  (!%p1865_p8), %s326_s19, 128, %s329_s16, [#allocation5]  }
  0x56   : > { %s1688_s2 = smov [#allocation12]   ;;  %p2155_p7 = scmp.ne.s32.totalorder %s2145_s25, 0 }
  0x57   : > { %s370_s4 = sshll.u32 %s1688_s2, 4  ;;  %s371_s4 = int_to_ptr.vmem [resolvable:$true] %s370_s4 }
  0x58   : > { %s1490_s28 = scalar_lea.vmem %s371_s4, 512  ;;  %p2156_p4 = pneg %p2155_p7 }
  0x59   : > { %p1491_p1 = scmp.ne.s32.totalorder %s371_s4, %s1490_s28  ;;  %p1498_p13 = scmp.lt.s32.totalorder %s371_s4, %s371_s4 }
  0x5a   : > { %p1499_p9 = scmp.lt.s32.totalorder %s1490_s28, %s1490_s28 }
  0x5b   : > { %p1493_p12 = pnand %p1491_p1, %p2156_p4 }
  0x5c   : > { %p1500_p2 = por %p1499_p9, %p1498_p13 }
  0x5d   : > { %p1494_p5 = pneg %p1493_p12 }
  0x5f   : > { %p1501_p6 = pnand %p1500_p2, %p1494_p5 }
  0x61   : > { %1504 = shalt.err (!%p1501_p6)
}
  0x62   : > { %s2157_s30 = smov 8   ;;  %s2158_s20 = smov 128  }
  0x63   : > { %s2159_s6 = sld [smem:[#allocation28_spill]]  ;;  %s44_s11 = sadd.s32 1, %s1677_s17 }
  0x64   : > { %s51_s12 = sadd.s32 1, %s1669_s15  ;;  %p46_p3 = scmp.ge.s32.totalorder %s44_s11, 2 }
  0x65   : > { %p1334_p11 = scmp.lt.s32.totalorder %s1681_s18, 2  ;;  %s387_s25 = sand.u32 1, %s1681_s18  }
  0x66   : > { %s389_s27 = sand.u32 1, %s1669_s15   ;;  %s2181_s11 = smov (%p46_p3, %s44_s11), 0 }
  0x67   : > { %s1185_s2 = sshll.u32 %s389_s27, 3  ;;  %s48_s28 = ssub.s32 %s1677_s17, %s2181_s11 }
  0x68   : > { %p49_p8 = scmp.eq.s32.totalorder %s48_s28, 0  ;;  %s1186_s19 = sshll.u32 %s1677_s17, 7 }
  0x69   : > { %1316 = dma.hbm_to_vmem [thread:$0]  (!%p2155_p7), %s2159_s6, 512, %s371_s4, [#allocation11], %s2158_s20, %s2158_s20, %s2157_s30  }
  0x6a   : > { %s397_s13 = scalar_lea.hbm %s2115_s1, %s1186_s19  ;;  %s391_s4 = scalar_lea.vmem [#allocation7], %s1185_s2 }
  0x6b   : > { %s399_s30 = sshll.u32 %s391_s4, 4  ;;  %p2160_p0 = scmp.ne.s32.totalorder %s2149_s26, 0  ;;  %s400_s30 = int_to_ptr.vmem [resolvable:$true] %s399_s30 }
  0x6c   : > { %s1904_s20 = scalar_select %p49_p8, %s1669_s15, %s51_s12  }
  0x6d   : > { %p1910_p10 = pnand %p1334_p11, %p2160_p0  ;;  %s388_s27 = scalar_lea.sflag [#allocation8], %s387_s25 }
  0x6e   : > { %s1518_s28 = scalar_lea.vmem %s400_s30, 128  ;;  %s1689_s0 = smov [#allocation7]  }
  0x6f   : > { %p1507_p1 = pneg %p1910_p10  ;;  %p1519_p7 = scmp.ne.s32.totalorder %s400_s30, %s1518_s28 }
  0x70   : > { %s1523_s2 = sshll.u32 %s1689_s0, 4  ;;  %s1524_s2 = int_to_ptr.vmem [resolvable:$false] %s1523_s2 }
  0x71   : > { %p1521_p4 = pnand %p1519_p7, %p1507_p1  ;;  %s1525_s12 = scalar_lea.vmem %s1524_s2, 256 }
  0x72   : > { %p1526_p5 = scmp.lt.s32.totalorder %s400_s30, %s1524_s2  ;;  %p1527_p13 = scmp.lt.s32.totalorder %s1525_s12, %s1518_s28 }
  0x73   : > { %p1522_p12 = pneg %p1521_p4 }
  0x74   : > { %p1528_p9 = por %p1527_p13, %p1526_p5 }
  0x76   : > { %p1529_p2 = pnand %p1528_p9, %p1522_p12 }
  0x78   : > { %1532 = shalt.err (!%p1529_p2)
}
  0x79   : > { %1320 = dma.hbm_to_vmem [thread:$0]  (!%p1910_p10), %s397_s13, 128, %s400_s30, %s388_s27  }
  0x7a   : > { %p2162_p6 = scmp.ne.s32.totalorder %s2144_s22, 0 }
  0x7b   : > { %p2163_p3 = scmp.ne.s32.totalorder (!%p2162_p6), %s2148_s23, 0 }
  0x7c   : > { %408 = sbr.rel (%p2162_p6) target bundleno = 1233 (0x4d1), region = 52 }
  0x81   : > { %1636 = dma.done.wait (%p2163_p3), [#allocation5], 128  }
  0x82   : > { %1638 = vsyncadd (%p2163_p3), [#allocation5], 4294967168  ;;  %s2138_s26 = sand.u32 1, %s1781_s21   ;;  %s416_s25 = sand.u32 1, %s1665_s14  }
  0x83   : > { %s1928_s19 = sshll.u32 %s416_s25, 3  ;;  %s415_s6 = scalar_lea.sflag [#allocation8], %s2138_s26 }
  0x84   : > { %s418_s13 = scalar_lea.vmem [#allocation7], %s1928_s19 }
  0x85   : > { %1640 = dma.done.wait (%p2163_p3), %s415_s6, 128  }
  0x86   : > { %1642 = vsyncadd (%p2163_p3), %s415_s6, 4294967168  ;;  %p2164_p11 = scmp.eq.s32.totalorder %s1781_s21, 0 }
  0x88   : > { %1644 = dma.done.wait (%p2164_p11), [#allocation8], 512   ;;  %p2165_p8 = pmov %p2164_p11 }
  0x8a   : > { %1646 = vsyncadd (%p2165_p8), [#allocation8], 4294966784  ;;  %p2166_p0 = pmov %p2165_p8 }
  0x8c   : > { %1648 = dma.done.wait (%p2166_p0), [#allocation11], 1024   ;;  %p2167_p10 = pmov %p2166_p0 }
  0x8d   : > { %v1690_v0 = vmov 0.0   ;;  %vm1691_vm0 = vmmov 0   ;;  %v485_v1 = vld [vmem:[#allocation10 + $0x18] sm:$0xff]  ;;  %v484_v2 = vld [vmem:[#allocation10 + $0x10] sm:$0xff]  ;;  %v483_v3 = vld [vmem:[#allocation10 + $0x8] sm:$0xff]  ;;  %vm493_vm1 = vcmask 261120   ;;  %s962_s6 = scalar_lea.hbm %s2122_s8, %s1850_s24 }
  0x8e   : > { %1650 = vsyncadd (%p2167_p10), [#allocation11], 4294966272  ;;  %1233 = vmatprep.subr.mxu0 %v1690_v0  ;;  %1241 = vmatprep.mubr.msk.f32.mxu0 %vm1691_vm0, %v1690_v0  ;;  %v482_v4 = vld [vmem:[#allocation10] sm:$0xff]  ;;  %v481_v5 = vld [vmem:[#allocation4] sm:$0xff]  ;;  %s462_s30 = scalar_lea.vmem [#allocation13], %s1928_s19  ;;  %vm600_vm2 = vcmask 64512  }
  0x8f   : > { %1244 = vmatprep.subr.mxu1 %v1690_v0  ;;  %1252 = vmatprep.mubr.msk.f32.mxu1 %vm1691_vm0, %v1690_v0  ;;  %v691_v6 = vld [vmem:[#allocation9 + $0x18] sm:$0xff]  ;;  %v690_v7 = vld [vmem:[#allocation9 + $0x10] sm:$0xff]  ;;  %v689_v8 = vld [vmem:[#allocation9 + $0x8] sm:$0xff]  ;;  %s476_s0 = scalar_lea.vmem [#allocation16], %s1928_s19  ;;  %s940_s22 = scalar_lea.sflag [#allocation6], %s416_s25 }
  0x90   : > { %1234 = vmatpush3.msra.mxu0 %v485_v1  ;;  %v688_v9 = vld [vmem:[#allocation9] sm:$0xff]  ;;  %v687_v10 = vld [vmem:[%s418_s13] sm:$0xff]  ;;  %v606_v18 = vld [vmem:[#allocation12 + $0x8] sm:$0xff]  ;;  %s964_s13 = sshll.u32 %s462_s30, 4  ;;  %p2168_p7 = scmp.ne.s32.totalorder %s2150_s29, 0  ;;  %s965_s13 = int_to_ptr.vmem [resolvable:$true] %s964_s13 }
  0x91   : > { %1235 = vmatprep.subr.mxu0 %v1690_v0  ;;  %v1195_v11 = vld [vmem:[%s2119_s5] ss:$0 sm:$0xff]  ;;  %v608_v16 = vld [vmem:[#allocation12 + $0x18] sm:$0xff]  ;;  %v607_v17 = vld [vmem:[#allocation12 + $0x10] sm:$0xff]  ;;  %s1533_s23 = scalar_lea.vmem %s965_s13, 128  ;;  %s1692_s16 = smov [#allocation13]  }
  0x92   : > { %1236 = vmatpush3.msra.mxu0 %v484_v2  ;;  %1245 = vmatpush3.msra.mxu1 %v608_v16  ;;  %v605_v19 = vld [vmem:[#allocation12] sm:$0xff]  ;;  %p1534_p1 = scmp.ne.s32.totalorder %s965_s13, %s1533_s23  ;;  %s1537_s4 = sshll.u32 %s1692_s16, 4  ;;  %s1538_s4 = int_to_ptr.vmem [resolvable:$false] %s1537_s4 }
  0x93   : > { %1237 = vmatprep.subr.mxu0 %v1690_v0  ;;  %1246 = vmatprep.subr.mxu1 %v1690_v0  ;;  %v1199_v20 = vld [vmem:[%s2117_s3] ss:$0 sm:$0xff]  ;;  %s1539_s27 = scalar_lea.vmem %s1538_s4, 256  ;;  %p1540_p5 = scmp.lt.s32.totalorder %s965_s13, %s1538_s4 }
  0x94   : > { %1238 = vmatpush3.msra.mxu0 %v483_v3  ;;  %1247 = vmatpush3.msra.mxu1 %v607_v17  ;;  %v1197_v32 = vld [vmem:[%s2121_s7] ss:$0 sm:$0xff]  ;;  %p1535_p4 = pnand %p1534_p1, %p2168_p7  ;;  %p1541_p13 = scmp.lt.s32.totalorder %s1539_s27, %s1533_s23 }
  0x95   : > { %1239 = vmatprep.subr.mxu0 %v1690_v0  ;;  %1248 = vmatprep.subr.mxu1 %v1690_v0 }
  0x96   : > { %1240 = vmatpush3.msra.mxu0 %v482_v4  ;;  %1249 = vmatpush3.msra.mxu1 %v606_v18  ;;  %p1536_p12 = pneg %p1535_p4  ;;  %p1542_p9 = por %p1541_p13, %p1540_p5 }
  0x97   : > { %1242 = vmatmul.mubr.msk.f32.vlgmr.msra.gmra.mxu0 %vm493_vm1, %v481_v5  ;;  %1255 = vmatprep.subr.mxu0 %v1690_v0 }
  0x98   : > { %1256 = vmatpush3.msra.mxu0 %v691_v6  ;;  %1263 = vmatprep.mubr.msk.f32.mxu0 %vm1691_vm0, %v1690_v0  ;;  %p1543_p2 = pnand %p1542_p9, %p1536_p12 }
  0x99   : > { %1257 = vmatprep.subr.mxu0 %v1690_v0  ;;  %1250 = vmatprep.subr.mxu1 %v1690_v0 }
  0x9a   : > { %1258 = vmatpush3.msra.mxu0 %v690_v7  ;;  %1251 = vmatpush3.msra.mxu1 %v605_v19 }
  0x9b   : > { %1259 = vmatprep.subr.mxu0 %v1690_v0  ;;  %1253 = vmatmul.mubr.msk.f32.vlgmr.msra.gmra.mxu1 %vm493_vm1, %v481_v5 }
  0x9c   : > { %1260 = vmatpush3.msra.mxu0 %v689_v8  ;;  %1266 = vmatprep.subr.mxu1 %v1690_v0 }
  0x9d   : > { %1261 = vmatprep.subr.mxu0 %v1690_v0  ;;  %1274 = vmatprep.mubr.msk.f32.mxu1 %vm1691_vm0, %v1690_v0 }
  0x9e   : > { %1262 = vmatpush3.msra.mxu0 %v688_v9 }
  0x9f   : > { %1264 = vmatmul.mubr.msk.f32.vlgmr.msra.gmra.mxu0 %vm493_vm1, %v687_v10  ;;  %1277 = vmatprep.subr.mxu0 %v1690_v0 }
  0xa0   : > { %1279 = vmatprep.mubr.msk.f32.mxu0 %vm1691_vm0, %v1690_v0 }
 0x157   : > { %v563_v12 = vpop.f32.mrf.mxu0 }
 0x158   : > { %v564_v13 = vadd.f32 %v1195_v11, %v563_v12 }
 0x159   : > { %v1243_v14 = vpop.f32.mrf.mxu0 }
 0x15a   : > { %v567_v15 = vmul.f32 5.656854, %v564_v13 }
 0x15b   : > { %v682_v33 = vpop.f32.mrf.mxu1 }
 0x15c   : > { %568 = vxpose.xlu0.b32.start.end [1/1] (short) (narrow) %v567_v15, 32  ;;  %v683_v34 = vadd.f32 %v1197_v32, %v682_v33 }
 0x15d   : > { %v1254_v35 = vpop.f32.mrf.mxu1 }
 0x15e   : > { %686 = vst.msk [vmem:[#allocation3] sm:$0xff] %vm493_vm1, %v683_v34 }
 0x15f   : > { %v769_v21 = vpop.f32.mrf.mxu0 }
 0x160   : > { %v770_v22 = vadd.f32 %v1199_v20, %v769_v21 }
 0x161   : > { %v1265_v23 = vpop.f32.mrf.mxu0 }
 0x162   : > { %773 = vst.msk [vmem:[%s462_s30] sm:$0xff] %vm493_vm1, %v770_v22 }
 0x165   : > { %v863_v36 = vld [vmem:[#allocation3] sm:$0xff] }
 0x166   : > { %1278 = vmatpush3.msra.mxu0 %v863_v36 }
 0x1d8   : > { %v584_v24 = vpop.trf.xlu0 }
 0x1d9   : > { %601 = vst.msk [vmem:[#allocation2] sm:$0xff] %vm600_vm2, %v584_v24 }
 0x1dc   : > { %v585_v25 = vpop.trf.xlu0 }
 0x1dd   : > { %602 = vst.msk [vmem:[#allocation2 + $0x8] sm:$0xff] %vm600_vm2, %v585_v25 }
 0x1e0   : > { %v586_v26 = vpop.trf.xlu0  ;;  %v774_v31 = vld [vmem:[#allocation2] sm:$0xff] }
 0x1e1   : > { %603 = vst.msk [vmem:[#allocation2 + $0x10] sm:$0xff] %vm600_vm2, %v586_v26 }
 0x1e4   : > { %v587_v27 = vpop.trf.xlu0  ;;  %v775_v30 = vld [vmem:[#allocation2 + $0x8] sm:$0xff] }
 0x1e5   : > { %604 = vst.msk [vmem:[#allocation2 + $0x18] sm:$0xff] %vm600_vm2, %v587_v27 }
 0x1e8   : > { %v776_v29 = vld [vmem:[#allocation2 + $0x10] sm:$0xff] }
 0x1ec   : > { %v777_v28 = vld [vmem:[#allocation2 + $0x18] sm:$0xff] }
 0x1ed   : > { %1267 = vmatpush3.msra.mxu1 %v777_v28 }
 0x1ee   : > { %1268 = vmatprep.subr.mxu1 %v1690_v0 }
 0x1ef   : > { %1269 = vmatpush3.msra.mxu1 %v776_v29 }
 0x1f0   : > { %1270 = vmatprep.subr.mxu1 %v1690_v0 }
 0x1f1   : > { %1271 = vmatpush3.msra.mxu1 %v775_v30 }
 0x1f2   : > { %1272 = vmatprep.subr.mxu1 %v1690_v0 }
 0x1f3   : > { %1273 = vmatpush3.msra.mxu1 %v774_v31 }
 0x1f4   : > { %1275 = vmatmul.mubr.msk.f32.vlgmr.msra.gmra.mxu1 %vm493_vm1, %v770_v22 }
 0x2b4   : > { %v847_v37 = vpop.f32.mrf.mxu1 }
 0x2b5   : > { %v852_v38 = vsel %vm600_vm2, %v847_v37, -inf }
 0x2b6   : > { %853 = vmax.xlane.f32.xlu0 %v852_v38  ;;  %v1276_v39 = vpop.f32.mrf.mxu1 }
 0x33f   : > { %v854_v40 = vpop.xlane.xlu0 %853 }
 0x340   : > { %v855_v41 = vsub.f32 %v847_v37, %v854_v40 }
 0x342   : > { %v856_v42 = vmul.f32 1.442695, %v855_v41 }
 0x344   : > { %1395 = vpow2.f32 %v856_v42 }
 0x351   : > { %v1396_v43 = vpop.eup %1395 }
 0x352   : > { %v858_v44 = vsel %vm600_vm2, %v1396_v43, 0.0 }
 0x353   : > { %859 = vadd.xlane.f32.xlu1 %v858_v44 }
 0x3dc   : > { %v860_v45 = vpop.xlane.xlu1 %859 }
 0x3dd   : > { %1397 = vrcp.f32 %v860_v45 }
 0x3ea   : > { %v1398_v46 = vpop.eup %1397 }
 0x3eb   : > { %v862_v47 = vmul.f32 %v1398_v46, %v1396_v43 }
 0x3ed   : > { %1280 = vmatmul.mubr.msk.f32.vlgmr.msra.gmra.mxu0 %vm600_vm2, %v862_v47  ;;  %938 = vst.msk [vmem:[%s476_s0] sm:$0xff] %vm600_vm2, %v862_v47 }
 0x3ee   : > { %1546 = shalt.err (!%p1543_p2)
}
 0x3ef   : > { %s1547_s28 = scalar_lea.hbm %s962_s6, 128  ;;  %s1551_s2 = scalar_lea.hbm %s2122_s8, 256 }
 0x3f0   : > { %p1548_p6 = scmp.ne.s32.totalorder %s962_s6, %s1547_s28  ;;  %p1552_p8 = scmp.lt.s32.totalorder %s962_s6, %s2122_s8 }
 0x3f1   : > { %p1553_p0 = scmp.lt.s32.totalorder %s1551_s2, %s1547_s28 }
 0x3f2   : > { %p1549_p3 = pnand %p1548_p6, %p2168_p7 }
 0x3f3   : > { %p1554_p10 = por %p1553_p0, %p1552_p8 }
 0x3f4   : > { %p1550_p11 = pneg %p1549_p3 }
 0x3f6   : > { %p1555_p1 = pnand %p1554_p10, %p1550_p11 }
 0x3f8   : > { %1558 = shalt.err (!%p1555_p1)
}
 0x3f9   : > { %1298 = dma.vmem_to_hbm [thread:$0]  (%p2168_p7), %s965_s13, 128, %s962_s6, %s940_s22  }
 0x3fa   : > { %s469_s23 = scalar_lea.vmem [#allocation14], %s1928_s19  ;;  %s992_s4 = sshll.u32 %s476_s0, 4  ;;  %s2040_s4 = int_to_ptr.vmem [resolvable:$true] %s992_s4 }
 0x3fb   : > { %s978_s16 = sshll.u32 %s469_s23, 4  ;;  %s2030_s28 = scalar_lea.hbm %s2123_s9, %s1850_s24  ;;  %s2032_s16 = int_to_ptr.vmem [resolvable:$true] %s978_s16 }
 0x3fc   : > { %s2038_s2 = scalar_lea.hbm %s2124_s10, %s1850_s24  ;;  %s2169_s19 = sand.u32 1, %s1781_s21  }
 0x3fd   : > { %s2045_s0 = scalar_lea.sflag [#allocation15], %s2169_s19  ;;  %s1559_s6 = scalar_lea.vmem %s2032_s16, 128 }
 0x3fe   : > { %p1560_p4 = scmp.ne.s32.totalorder %s2032_s16, %s1559_s6  ;;  %s1693_s13 = smov [#allocation14]  }
 0x3ff   : > { %s1563_s22 = sshll.u32 %s1693_s13, 4  ;;  %s1564_s22 = int_to_ptr.vmem [resolvable:$false] %s1563_s22 }
 0x400   : > { %p1561_p12 = pnand %p1560_p4, %p2168_p7  ;;  %s1565_s12 = scalar_lea.vmem %s1564_s22, 256 }
 0x401   : > { %p1566_p13 = scmp.lt.s32.totalorder %s2032_s16, %s1564_s22  ;;  %p1567_p9 = scmp.lt.s32.totalorder %s1565_s12, %s1559_s6 }
 0x402   : > { %p1562_p5 = pneg %p1561_p12 }
 0x403   : > { %p1568_p2 = por %p1567_p9, %p1566_p13 }
 0x405   : > { %p1569_p6 = pnand %p1568_p2, %p1562_p5 }
 0x4ad   : > { %v933_v48 = vpop.f32.mrf.mxu0 }
 0x4ae   : > { %937 = vst.msk [vmem:[%s469_s23] sm:$0xff] %vm493_vm1, %v933_v48 }
 0x4af   : > { %v1281_v49 = vpop.f32.mrf.mxu0 }
 0x4b0   : > { %1572 = shalt.err (!%p1569_p6)
}
 0x4b1   : > { %s1573_s21 = scalar_lea.hbm %s2030_s28, 128  ;;  %s1577_s27 = scalar_lea.hbm %s2123_s9, 256 }
 0x4b2   : > { %p1574_p3 = scmp.ne.s32.totalorder %s2030_s28, %s1573_s21  ;;  %p1578_p0 = scmp.lt.s32.totalorder %s2030_s28, %s2123_s9 }
 0x4b3   : > { %p1579_p10 = scmp.lt.s32.totalorder %s1577_s27, %s1573_s21 }
 0x4b4   : > { %p1575_p11 = pnand %p1574_p3, %p2168_p7 }
 0x4b5   : > { %p1580_p1 = por %p1579_p10, %p1578_p0 }
 0x4b6   : > { %p1576_p8 = pneg %p1575_p11 }
 0x4b8   : > { %p1581_p4 = pnand %p1580_p1, %p1576_p8 }
 0x4ba   : > { %1584 = shalt.err (!%p1581_p4)
}
 0x4bb   : > { %1299 = dma.vmem_to_hbm [thread:$0]  (%p2168_p7), %s2032_s16, 128, %s2030_s28, %s2045_s0  }
 0x4bc   : > { %s1585_s30 = scalar_lea.vmem %s2040_s4, 128  ;;  %s1694_s19 = smov [#allocation16]  }
 0x4bd   : > { %p1586_p12 = scmp.ne.s32.totalorder %s2040_s4, %s1585_s30  ;;  %s1589_s6 = sshll.u32 %s1694_s19, 4  ;;  %s1590_s6 = int_to_ptr.vmem [resolvable:$false] %s1589_s6 }
 0x4be   : > { %s1591_s13 = scalar_lea.vmem %s1590_s6, 256  ;;  %p1592_p9 = scmp.lt.s32.totalorder %s2040_s4, %s1590_s6 }
 0x4bf   : > { %p1587_p5 = pnand %p1586_p12, %p2168_p7  ;;  %p1593_p2 = scmp.lt.s32.totalorder %s1591_s13, %s1585_s30 }
 0x4c1   : > { %p1588_p13 = pneg %p1587_p5  ;;  %p1594_p6 = por %p1593_p2, %p1592_p9 }
 0x4c3   : > { %p1595_p3 = pnand %p1594_p6, %p1588_p13 }
 0x4c5   : > { %1598 = shalt.err (!%p1595_p3)
}
 0x4c6   : > { %s1599_s22 = scalar_lea.hbm %s2038_s2, 128  ;;  %s1603_s12 = scalar_lea.hbm %s2124_s10, 256 }
 0x4c7   : > { %p1600_p11 = scmp.ne.s32.totalorder %s2038_s2, %s1599_s22  ;;  %p1604_p10 = scmp.lt.s32.totalorder %s2038_s2, %s2124_s10 }
 0x4c8   : > { %p1605_p1 = scmp.lt.s32.totalorder %s1603_s12, %s1599_s22 }
 0x4c9   : > { %p1601_p8 = pnand %p1600_p11, %p2168_p7 }
 0x4ca   : > { %p1606_p4 = por %p1605_p1, %p1604_p10 }
 0x4cb   : > { %p1602_p0 = pneg %p1601_p8 }
 0x4cd   : > { %p1607_p12 = pnand %p1606_p4, %p1602_p0 }
 0x4cf   : > { %1610 = shalt.err (!%p1607_p12)
}
 0x4d0   : > { %1300 = dma.vmem_to_hbm [thread:$0]  (%p2168_p7), %s2040_s4, 128, %s2038_s2, %s2045_s0  }
 0x4d1 PF: > { %s2170_s23 = sld [smem:[#allocation23_spill]]  ;;  %p2173_p13 = scmp.ge.s32.totalorder %s1681_s18, 2 }
 0x4d2   : > { %s2171_s27 = sld [smem:[#allocation24_spill]] }
 0x4d7   : > { %s1004_s26 = sand.u32 1, %s2170_s23  }
 0x4d8   : > { %p2172_p5 = scmp.ne.s32.totalorder %s2171_s27, 0  ;;  %s1005_s25 = scalar_lea.sflag [#allocation6], %s1004_s26 }
 0x4da   : > { %p1322_p9 = pnand %p2173_p13, %p2172_p5 }
 0x4dc   : > { %p1323_p2 = pneg %p1322_p9 }
 0x4de   : > { %1652 = dma.done.wait (%p1323_p2), %s1005_s25, 128  }
 0x4df   : > { %1654 = vsyncadd (%p1323_p2), %s1005_s25, 4294967168  ;;  %s2174_s30 = sadd.s32 4294967294, %s1681_s18  }
 0x4e0   : > { %s1013_s19 = sand.u32 1, %s2174_s30  }
 0x4e1   : > { %s1014_s29 = scalar_lea.sflag [#allocation15], %s1013_s19 }
 0x4e2   : > { %1656 = dma.done.wait (%p1323_p2), %s1014_s29, 256  }
 0x4e3   : > { %1658 = vsyncadd (%p1323_p2), %s1014_s29, 4294967040  ;;  %s32_s18 = sadd.s32 1, %s1681_s18   ;;  %s2175_s13 = smov %s1665_s14 }
 0x4e4   : > { %p29_p7 = scmp.ge.s32.totalorder %s32_s18, 4   ;;  %s2176_s14 = smov %s1669_s15 }
 0x4e5   : > { %s2177_s15 = smov %s1904_s20  ;;  %s2178_s16 = smov %s1677_s17 }
 0x4e6   : > { %s2179_s17 = smov %s2181_s11  ;;  %31 = sbr.rel (!%p29_p7) target bundleno = 15 (0xf), region = 151 }
 0x4eb   :  { %1028 = vsyncpa [#allocation5], 1 }
 0x4ec   :  { %1030 = vsyncpa [#allocation5 + $0x1], 1 }
 0x4ed   :  { %1031 = vsyncpa [#allocation8], 1 }
 0x4ee   :  { %1033 = vsyncpa [#allocation8 + $0x1], 1 }
 0x4ef   :  { %1034 = vsyncpa [#allocation11], 1 }
 0x4f0   :  { %1035 = vsyncpa [#allocation6], 1 }
 0x4f1   :  { %1037 = vsyncpa [#allocation6 + $0x1], 1 }
 0x4f2   :  { %1038 = vsyncpa [#allocation15], 1 }
 0x4f3   :  { %1040 = vsyncpa [#allocation15 + $0x1], 1 }

// kernel: tpu_custom_call.1
= control target key start
LH: loop header
LB: loop body
LE: loop exit
PB: predicated region body
PF: predicated region fallthrough
CT: control target
= control target key end

     0   :  { %s2118_s0 = inlined_call_operand.hbm [shape: f32[2,8,32], index: 0, kind: input, shape index: {}]   ;;  %s2119_s1 = inlined_call_operand.hbm [shape: f32[2,8,32], index: 1, kind: input, shape index: {}]   ;;  %s2120_s2 = inlined_call_operand.hbm [shape: f32[32,32], index: 2, kind: input, shape index: {}]   ;;  %s2121_s3 = inlined_call_operand.vmem [shape: f32[1,32], index: 3, kind: input, shape index: {}]   ;;  %s2122_s4 = inlined_call_operand.hbm [shape: f32[32,32], index: 4, kind: input, shape index: {}]   ;;  %s2123_s5 = inlined_call_operand.vmem [shape: f32[1,32], index: 5, kind: input, shape index: {}]   ;;  %s2124_s6 = inlined_call_operand.hbm [shape: f32[32,32], index: 6, kind: input, shape index: {}]   ;;  %s2125_s7 = inlined_call_operand.vmem [shape: f32[1,32], index: 7, kind: input, shape index: {}]   ;;  %s2126_s8 = inlined_call_operand.hbm [shape: f32[2,8,32], index: 8, kind: output, shape index: {0}]   ;;  %s2127_s9 = inlined_call_operand.hbm [shape: f32[2,8,32], index: 9, kind: output, shape index: {1}]   ;;  %s2128_s10 = inlined_call_operand.hbm [shape: f32[2,8,8], index: 10, kind: output, shape index: {2}]  }
   0x1   :  { %2136 = sst [smem:[#allocation26_spill]] %s2118_s0 }
   0x2   :  { %2137 = sst [smem:[#allocation27_spill]] %s2120_s2 }
   0x3   :  { %2138 = sst [smem:[#allocation28_spill]] %s2122_s4 }
   0x4   :  { %2139 = sst [smem:[#allocation29_spill]] %s2124_s6 }
   0x5   :  { %2140 = sst [smem:[#allocation30_spill]] %s2128_s10 }
   0x6   :  { %16 = vsyncpa [#allocation5], 0 }
   0x7   :  { %18 = vsyncpa [#allocation5 + $0x1], 0 }
   0x8   :  { %19 = vsyncpa [#allocation8], 0 }
   0x9   :  { %21 = vsyncpa [#allocation8 + $0x1], 0 }
   0xa   :  { %22 = vsyncpa [#allocation11], 0 }
   0xb   :  { %23 = vsyncpa [#allocation6], 0 }
   0xc   :  { %25 = vsyncpa [#allocation6 + $0x1], 0 }
   0xd   :  { %26 = vsyncpa [#allocation15], 0 }
   0xe   :  { %28 = vsyncpa [#allocation15 + $0x1], 0  ;;  %s1777_s13 = smov 0   ;;  %s1779_s14 = smov 0  }
   0xf   :  { %s1781_s15 = smov 0   ;;  %s1783_s16 = smov 0  }
  0x10   :  { %s1785_s17 = smov 0   ;;  %s1787_s18 = smov 0  }
  0x11 LB: > { %2141 = sst [smem:[#allocation23_spill]] %s1688_s13  ;;  %s1808_s19 = sadd.s32 4294967295, %s1708_s18   ;;  %s1708_s18 = sphi %s1787_s18, %s34_s18   ;;  %s1704_s17 = sphi %s1785_s17, %s2171_s17   ;;  %s1700_s16 = sphi %s1783_s16, %s2170_s16   ;;  %s1696_s15 = sphi %s1781_s15, %s2169_s15   ;;  %s1692_s14 = sphi %s1779_s14, %s2168_s14   ;;  %s1688_s13 = sphi %s1777_s13, %s2167_s13  }
  0x12   : > { %s2129_s20 = sadd.s32 4294967294, %s1708_s18   ;;  %p66_p0 = scmp.ne.s32.totalorder %s1692_s14, %s1688_s13 }
  0x13   : > { %p2130_p1 = scmp.eq.s32.totalorder %s1808_s19, 0  ;;  %p252_p3 = scmp.eq.s32.totalorder %s2129_s20, 1 }
  0x14   : > { %p1205_p5 = scmp.ge.s32.totalorder %s1708_s18, 1  ;;  %p315_p7 = scmp.lt.s32.totalorder %s1708_s18, 3 }
  0x15   : > { %p1819_p4 = por %p2130_p1, %p66_p0  ;;  %p1824_p6 = por %p252_p3, %p66_p0 }
  0x16   : > { %p1829_p8 = pnand %p1205_p5, %p315_p7  ;;  %s1710_s24 = smov [#allocation9]  }
  0x17   : > { %s2142_s21 = scalar_select %p1819_p4, 1, 0 }
  0x18   : > { %s2143_s22 = scalar_select %p1824_p6, 1, 0 }
  0x19   : > { %s327_s25 = sshll.u32 %s1710_s24, 4  ;;  %p1332_p9 = pneg %p1829_p8  ;;  %s328_s25 = int_to_ptr.vmem [resolvable:$true] %s327_s25 }
  0x1a   : > { %2144 = sst [smem:[#allocation24_spill]] %s2143_s22  ;;  %s1711_s27 = smov [#allocation10]  }
  0x1b   : > { %p1838_p11 = pnand %p1332_p9, %p2130_p1  ;;  %s343_s28 = sshll.u32 %s1711_s27, 4  ;;  %s344_s28 = int_to_ptr.vmem [resolvable:$true] %s343_s28 }
  0x1c   : > { %s1712_s29 = smov [#allocation12]   ;;  %s1437_s11 = scalar_lea.vmem %s328_s25, 512 }
  0x1d   : > { %s359_s30 = sshll.u32 %s1712_s29, 4  ;;  %p1428_p12 = pneg %p1838_p11  ;;  %s360_s30 = int_to_ptr.vmem [resolvable:$true] %s359_s30 }
  0x1e   : > { %p1438_p13 = scmp.ne.s32.totalorder %s328_s25, %s1437_s11  ;;  %p1445_p5 = scmp.lt.s32.totalorder %s328_s25, %s328_s25 }
  0x1f   : > { %p1446_p7 = scmp.lt.s32.totalorder %s1437_s11, %s1437_s11 }
  0x20   : > { %p1440_p0 = pnand %p1438_p13, %p1428_p12 }
  0x21   : > { %p1447_p9 = por %p1446_p7, %p1445_p5 }
  0x22   : > { %p1441_p3 = pneg %p1440_p0 }
  0x24   : > { %p1448_p10 = pnand %p1447_p9, %p1441_p3 }
  0x26   : > { %1451 = shalt.err (!%p1448_p10)
}
  0x27   : > { %s1713_s12 = smov 128   ;;  %s1714_s24 = smov 8  }
  0x28   : > { %s2147_s2 = sld [smem:[#allocation27_spill]]  ;;  %s1463_s20 = scalar_lea.vmem %s344_s28, 512 }
  0x29   : > { %p1464_p1 = scmp.ne.s32.totalorder %s344_s28, %s1463_s20  ;;  %p1471_p2 = scmp.lt.s32.totalorder %s344_s28, %s344_s28 }
  0x2a   : > { %p1472_p6 = scmp.lt.s32.totalorder %s1463_s20, %s1463_s20 }
  0x2b   : > { %p1466_p13 = pnand %p1464_p1, %p1428_p12 }
  0x2c   : > { %p1473_p5 = por %p1472_p6, %p1471_p2 }
  0x2d   : > { %p1467_p0 = pneg %p1466_p13 }
  0x2e   : > { %1335 = dma.hbm_to_vmem [thread:$0]  (!%p1838_p11), %s2147_s2, 512, %s328_s25, [#allocation8], %s1713_s12, %s1713_s12, %s1714_s24  }
  0x2f   : > { %p1474_p3 = pnand %p1473_p5, %p1467_p0 }
  0x31   : > { %1477 = shalt.err (!%p1474_p3)
}
  0x32   : > { %s2148_s4 = sld [smem:[#allocation28_spill]]  ;;  %s1489_s25 = scalar_lea.vmem %s360_s30, 512 }
  0x33   : > { %p1490_p10 = scmp.ne.s32.totalorder %s360_s30, %s1489_s25  ;;  %p1497_p9 = scmp.lt.s32.totalorder %s360_s30, %s360_s30 }
  0x34   : > { %p1498_p13 = scmp.lt.s32.totalorder %s1489_s25, %s1489_s25 }
  0x35   : > { %p1492_p7 = pnand %p1490_p10, %p1428_p12 }
  0x36   : > { %p1499_p4 = por %p1498_p13, %p1497_p9 }
  0x37   : > { %p1493_p1 = pneg %p1492_p7 }
  0x38   : > { %1338 = dma.hbm_to_vmem [thread:$0]  (!%p1838_p11), %s2148_s4, 512, %s344_s28, [#allocation11], %s1713_s12, %s1713_s12, %s1714_s24  }
  0x39   : > { %p1500_p2 = pnand %p1499_p4, %p1493_p1 }
  0x3b   : > { %1503 = shalt.err (!%p1500_p2)
}
  0x3c   : > { %s2149_s6 = sld [smem:[#allocation29_spill]]  ;;  %s53_s22 = sadd.s32 1, %s1696_s15 }
  0x3d   : > { %s46_s28 = sadd.s32 1, %s1704_s17  ;;  %p60_p4 = scmp.ne.s32.totalorder %s1696_s15, %s1692_s14 }
  0x3e   : > { %p48_p6 = scmp.ge.s32.totalorder %s46_s28, 2  ;;  %p61_p12 = scmp.eq.s32.totalorder %s1708_s18, 0 }
  0x3f   : > { %p2150_p0 = scmp.eq.s32.totalorder %s1808_s19, 1  ;;  %p1362_p3 = scmp.lt.s32.totalorder %s1708_s18, 2 }
  0x40   : > { %s2173_s28 = smov (%p48_p6, %s46_s28), 0  ;;  %p62_p10 = por %p61_p12, %p60_p4 }
  0x41   : > { %p1875_p5 = por %p2150_p0, %p60_p4  ;;  %2152 = sst [smem:[#allocation25_spill]] %s2173_s28 }
  0x42   : > { %1341 = dma.hbm_to_vmem [thread:$0]  (!%p1838_p11), %s2149_s6, 512, %s360_s30, [#allocation11], %s1713_s12, %s1713_s12, %s1714_s24  }
  0x43   : > { %s376_s29 = sand.u32 1, %s1696_s15   ;;  %s50_s11 = ssub.s32 %s1704_s17, %s2173_s28 }
  0x44   : > { %p51_p11 = scmp.eq.s32.totalorder %s50_s11, 0  ;;  %s1210_s30 = sshll.u32 %s376_s29, 3 }
  0x45   : > { %s1211_s12 = sshll.u32 %s1704_s17, 7  ;;  %s2153_s0 = sld [smem:[#allocation26_spill]] }
  0x46   : > { %s1887_s24 = scalar_select %p51_p11, %s1696_s15, %s53_s22  }
  0x47   : > { %s380_s2 = scalar_lea.vmem [#allocation4], %s1210_s30  ;;  %p1894_p7 = pnand %p1362_p3, %p62_p10 }
  0x48   : > { %s387_s4 = sshll.u32 %s380_s2, 4  ;;  %s1901_s11 = scalar_lea.hbm %s2119_s1, %s1211_s12  ;;  %s388_s4 = int_to_ptr.vmem [resolvable:$true] %s387_s4 }
  0x49   : > { %s394_s22 = sand.u32 1, %s1708_s18   ;;  %s377_s28 = scalar_lea.sflag [#allocation5], %s376_s29 }
  0x4a   : > { %p1506_p1 = pneg %p1894_p7  ;;  %s1517_s25 = scalar_lea.vmem %s388_s4, 128 }
  0x4b   : > { %s385_s27 = scalar_lea.hbm %s2153_s0, %s1211_s12  ;;  %p1518_p9 = scmp.ne.s32.totalorder %s388_s4, %s1517_s25 }
  0x4c   : > { %s1715_s2 = smov [#allocation4]  }
  0x4d   : > { %p1520_p13 = pnand %p1518_p9, %p1506_p1  ;;  %s1522_s20 = sshll.u32 %s1715_s2, 4  ;;  %s1523_s20 = int_to_ptr.vmem [resolvable:$false] %s1522_s20 }
  0x4e   : > { %s1524_s0 = scalar_lea.vmem %s1523_s20, 256  ;;  %p1525_p4 = scmp.lt.s32.totalorder %s388_s4, %s1523_s20 }
  0x4f   : > { %p1521_p2 = pneg %p1520_p13  ;;  %p1526_p6 = scmp.lt.s32.totalorder %s1524_s0, %s1517_s25 }
  0x51   : > { %p1527_p12 = por %p1526_p6, %p1525_p4 }
  0x53   : > { %p1528_p0 = pnand %p1527_p12, %p1521_p2 }
  0x55   : > { %1531 = shalt.err (!%p1528_p0)
}
  0x56   : > { %1345 = dma.hbm_to_vmem [thread:$0]  (!%p1894_p7), %s385_s27, 128, %s388_s4, %s377_s28  }
  0x57   : > { %s398_s10 = scalar_lea.vmem [#allocation7], %s1210_s30  ;;  %s395_s29 = scalar_lea.sflag [#allocation8], %s394_s22 }
  0x58   : > { %s406_s13 = sshll.u32 %s398_s10, 4  ;;  %s1716_s2 = smov [#allocation7]   ;;  %s407_s13 = int_to_ptr.vmem [resolvable:$true] %s406_s13 }
  0x59   : > { %s1545_s12 = scalar_lea.vmem %s407_s13, 128  ;;  %s1550_s20 = sshll.u32 %s1716_s2, 4  ;;  %s1551_s20 = int_to_ptr.vmem [resolvable:$false] %s1550_s20 }
  0x5a   : > { %p1546_p3 = scmp.ne.s32.totalorder %s407_s13, %s1545_s12  ;;  %s1552_s0 = scalar_lea.vmem %s1551_s20, 256 }
  0x5b   : > { %p1553_p9 = scmp.lt.s32.totalorder %s407_s13, %s1551_s20  ;;  %p1554_p13 = scmp.lt.s32.totalorder %s1552_s0, %s1545_s12 }
  0x5c   : > { %p1548_p10 = pnand %p1546_p3, %p1506_p1 }
  0x5d   : > { %p1555_p2 = por %p1554_p13, %p1553_p9 }
  0x5e   : > { %p1549_p11 = pneg %p1548_p10 }
  0x60   : > { %p1556_p4 = pnand %p1555_p2, %p1549_p11 }
  0x62   : > { %1559 = shalt.err (!%p1556_p4)
}
  0x63   : > { %1348 = dma.hbm_to_vmem [thread:$0]  (!%p1894_p7), %s1901_s11, 128, %s407_s13, %s395_s29  }
  0x64   : > { %415 = sbr.rel (%p1829_p8) target bundleno = 1208 (0x4b8), region = 52  ;;  %s1920_s4 = sand.u32 (!%p1829_p8), 1, %s1692_s14  }
  0x65   : > { %s1923_s28 = sshll.u32 (!%p1829_p8), %s1920_s4, 3  ;;  %s418_s30 = scalar_lea.sflag (!%p1829_p8), [#allocation5], %s1920_s4 }
  0x66   : > { %s421_s27 = scalar_lea.vmem (!%p1829_p8), [#allocation4], %s1923_s28  ;;  %p2155_p1 = scmp.ne.s32.totalorder (!%p1829_p8), %s2142_s21, 0 }
  0x69   : > { %1663 = dma.done.wait (%p2155_p1), %s418_s30, 128  }
  0x6a   : > { %1665 = vsyncadd (%p2155_p1), %s418_s30, 4294967168  ;;  %s426_s6 = sand.u32 1, %s1808_s19   ;;  %s430_s11 = scalar_lea.vmem [#allocation7], %s1923_s28 }
  0x6b   : > { %s427_s23 = scalar_lea.sflag [#allocation8], %s426_s6 }
  0x6c   : > { %1667 = dma.done.wait (%p2155_p1), %s427_s23, 128  }
  0x6d   : > { %1669 = vsyncadd (%p2155_p1), %s427_s23, 4294967168  ;;  %p2156_p8 = scmp.eq.s32.totalorder %s1808_s19, 0 }
  0x6f   : > { %1671 = dma.done.wait (%p2156_p8), [#allocation8], 512   ;;  %p2157_p7 = pmov %p2156_p8 }
  0x71   : > { %1673 = vsyncadd (%p2157_p7), [#allocation8], 4294966784  ;;  %p2158_p6 = pmov %p2157_p7 }
  0x73   : > { %1675 = dma.done.wait (%p2158_p6), [#allocation11], 1024   ;;  %p2159_p12 = pmov %p2158_p6 }
  0x74   : > { %v1717_v0 = vmov 0.0   ;;  %vm1718_vm0 = vmmov 0   ;;  %v502_v1 = vld [vmem:[#allocation10 + $0x18] sm:$0xff]  ;;  %v501_v2 = vld [vmem:[#allocation10 + $0x10] sm:$0xff]  ;;  %v500_v3 = vld [vmem:[#allocation10 + $0x8] sm:$0xff]  ;;  %vm510_vm1 = vcmask 261120  }
  0x75   : > { %1677 = vsyncadd (%p2159_p12), [#allocation11], 4294966272  ;;  %1261 = vmatprep.subr.mxu0 %v1717_v0  ;;  %1269 = vmatprep.mubr.msk.f32.mxu0 %vm1718_vm0, %v1717_v0  ;;  %v499_v4 = vld [vmem:[#allocation10] sm:$0xff]  ;;  %v708_v6 = vld [vmem:[#allocation9 + $0x18] sm:$0xff]  ;;  %s479_s13 = scalar_lea.vmem [#allocation13], %s1923_s28  ;;  %vm617_vm2 = vcmask 64512  }
  0x76   : > { %1272 = vmatprep.subr.mxu1 %v1717_v0  ;;  %1280 = vmatprep.mubr.msk.f32.mxu1 %vm1718_vm0, %v1717_v0  ;;  %v498_v5 = vld [vmem:[%s421_s27] sm:$0xff]  ;;  %v707_v7 = vld [vmem:[#allocation9 + $0x10] sm:$0xff]  ;;  %v1223_v11 = vld [vmem:[%s2123_s5] ss:$0 sm:$0xff]  ;;  %s493_s2 = scalar_lea.vmem [#allocation16], %s1923_s28  ;;  %s2006_s20 = sshll.u32 %s1700_s16, 7 }
  0x77   : > { %1262 = vmatpush3.msra.mxu0 %v502_v1  ;;  %v706_v8 = vld [vmem:[#allocation9 + $0x8] sm:$0xff]  ;;  %v705_v9 = vld [vmem:[#allocation9] sm:$0xff]  ;;  %v704_v10 = vld [vmem:[%s430_s11] sm:$0xff]  ;;  %s979_s27 = scalar_lea.hbm %s2126_s8, %s2006_s20  ;;  %s981_s23 = sshll.u32 %s479_s13, 4  ;;  %s982_s23 = int_to_ptr.vmem [resolvable:$true] %s981_s23 }
  0x78   : > { %1263 = vmatprep.subr.mxu0 %v1717_v0  ;;  %v625_v16 = vld [vmem:[#allocation12 + $0x18] sm:$0xff]  ;;  %v624_v17 = vld [vmem:[#allocation12 + $0x10] sm:$0xff]  ;;  %v623_v18 = vld [vmem:[#allocation12 + $0x8] sm:$0xff]  ;;  %s957_s11 = scalar_lea.sflag [#allocation6], %s1920_s4  ;;  %s1560_s21 = scalar_lea.vmem %s982_s23, 128 }
  0x79   : > { %1264 = vmatpush3.msra.mxu0 %v501_v2  ;;  %1273 = vmatpush3.msra.mxu1 %v625_v16  ;;  %v622_v19 = vld [vmem:[#allocation12] sm:$0xff]  ;;  %v1227_v20 = vld [vmem:[%s2121_s3] ss:$0 sm:$0xff]  ;;  %p1561_p0 = scmp.ne.s32.totalorder %s982_s23, %s1560_s21  ;;  %s1719_s22 = smov [#allocation13]  }
  0x7a   : > { %1265 = vmatprep.subr.mxu0 %v1717_v0  ;;  %1274 = vmatprep.subr.mxu1 %v1717_v0  ;;  %v1225_v32 = vld [vmem:[%s2125_s7] ss:$0 sm:$0xff]  ;;  %s1564_s25 = sshll.u32 %s1719_s22, 4  ;;  %s1565_s25 = int_to_ptr.vmem [resolvable:$false] %s1564_s25 }
  0x7b   : > { %1266 = vmatpush3.msra.mxu0 %v500_v3  ;;  %1275 = vmatpush3.msra.mxu1 %v624_v17  ;;  %p1562_p3 = pnand %p1561_p0, %p1875_p5  ;;  %s1566_s10 = scalar_lea.vmem %s1565_s25, 256 }
  0x7c   : > { %1267 = vmatprep.subr.mxu0 %v1717_v0  ;;  %1276 = vmatprep.subr.mxu1 %v1717_v0  ;;  %p1567_p11 = scmp.lt.s32.totalorder %s982_s23, %s1565_s25  ;;  %p1568_p9 = scmp.lt.s32.totalorder %s1566_s10, %s1560_s21 }
  0x7d   : > { %1268 = vmatpush3.msra.mxu0 %v499_v4  ;;  %1277 = vmatpush3.msra.mxu1 %v623_v18  ;;  %p1563_p10 = pneg %p1562_p3 }
  0x7e   : > { %1270 = vmatmul.mubr.msk.f32.vlgmr.msra.gmra.mxu0 %vm510_vm1, %v498_v5  ;;  %1283 = vmatprep.subr.mxu0 %v1717_v0  ;;  %p1569_p13 = por %p1568_p9, %p1567_p11 }
  0x7f   : > { %1284 = vmatpush3.msra.mxu0 %v708_v6  ;;  %1291 = vmatprep.mubr.msk.f32.mxu0 %vm1718_vm0, %v1717_v0 }
  0x80   : > { %1285 = vmatprep.subr.mxu0 %v1717_v0  ;;  %1278 = vmatprep.subr.mxu1 %v1717_v0  ;;  %p1570_p2 = pnand %p1569_p13, %p1563_p10 }
  0x81   : > { %1286 = vmatpush3.msra.mxu0 %v707_v7  ;;  %1279 = vmatpush3.msra.mxu1 %v622_v19 }
  0x82   : > { %1287 = vmatprep.subr.mxu0 %v1717_v0  ;;  %1281 = vmatmul.mubr.msk.f32.vlgmr.msra.gmra.mxu1 %vm510_vm1, %v498_v5 }
  0x83   : > { %1288 = vmatpush3.msra.mxu0 %v706_v8  ;;  %1294 = vmatprep.subr.mxu1 %v1717_v0 }
  0x84   : > { %1289 = vmatprep.subr.mxu0 %v1717_v0  ;;  %1302 = vmatprep.mubr.msk.f32.mxu1 %vm1718_vm0, %v1717_v0 }
  0x85   : > { %1290 = vmatpush3.msra.mxu0 %v705_v9 }
  0x86   : > { %1292 = vmatmul.mubr.msk.f32.vlgmr.msra.gmra.mxu0 %vm510_vm1, %v704_v10  ;;  %1305 = vmatprep.subr.mxu0 %v1717_v0 }
  0x87   : > { %1307 = vmatprep.mubr.msk.f32.mxu0 %vm1718_vm0, %v1717_v0 }
 0x13e   : > { %v580_v12 = vpop.f32.mrf.mxu0 }
 0x13f   : > { %v581_v13 = vadd.f32 %v1223_v11, %v580_v12 }
 0x140   : > { %v1271_v14 = vpop.f32.mrf.mxu0 }
 0x141   : > { %v584_v15 = vmul.f32 5.656854, %v581_v13 }
 0x142   : > { %v699_v33 = vpop.f32.mrf.mxu1 }
 0x143   : > { %585 = vxpose.xlu0.b32.start.end [1/1] (short) (narrow) %v584_v15, 32  ;;  %v700_v34 = vadd.f32 %v1225_v32, %v699_v33 }
 0x144   : > { %v1282_v35 = vpop.f32.mrf.mxu1 }
 0x145   : > { %703 = vst.msk [vmem:[#allocation3] sm:$0xff] %vm510_vm1, %v700_v34 }
 0x146   : > { %v786_v21 = vpop.f32.mrf.mxu0 }
 0x147   : > { %v787_v22 = vadd.f32 %v1227_v20, %v786_v21 }
 0x148   : > { %v1293_v23 = vpop.f32.mrf.mxu0 }
 0x149   : > { %790 = vst.msk [vmem:[%s479_s13] sm:$0xff] %vm510_vm1, %v787_v22 }
 0x14c   : > { %v880_v36 = vld [vmem:[#allocation3] sm:$0xff] }
 0x14d   : > { %1306 = vmatpush3.msra.mxu0 %v880_v36 }
 0x1bf   : > { %v601_v24 = vpop.trf.xlu0 }
 0x1c0   : > { %618 = vst.msk [vmem:[#allocation2] sm:$0xff] %vm617_vm2, %v601_v24 }
 0x1c3   : > { %v602_v25 = vpop.trf.xlu0 }
 0x1c4   : > { %619 = vst.msk [vmem:[#allocation2 + $0x8] sm:$0xff] %vm617_vm2, %v602_v25 }
 0x1c7   : > { %v603_v26 = vpop.trf.xlu0  ;;  %v791_v31 = vld [vmem:[#allocation2] sm:$0xff] }
 0x1c8   : > { %620 = vst.msk [vmem:[#allocation2 + $0x10] sm:$0xff] %vm617_vm2, %v603_v26 }
 0x1cb   : > { %v604_v27 = vpop.trf.xlu0  ;;  %v792_v30 = vld [vmem:[#allocation2 + $0x8] sm:$0xff] }
 0x1cc   : > { %621 = vst.msk [vmem:[#allocation2 + $0x18] sm:$0xff] %vm617_vm2, %v604_v27 }
 0x1cf   : > { %v793_v29 = vld [vmem:[#allocation2 + $0x10] sm:$0xff] }
 0x1d3   : > { %v794_v28 = vld [vmem:[#allocation2 + $0x18] sm:$0xff] }
 0x1d4   : > { %1295 = vmatpush3.msra.mxu1 %v794_v28 }
 0x1d5   : > { %1296 = vmatprep.subr.mxu1 %v1717_v0 }
 0x1d6   : > { %1297 = vmatpush3.msra.mxu1 %v793_v29 }
 0x1d7   : > { %1298 = vmatprep.subr.mxu1 %v1717_v0 }
 0x1d8   : > { %1299 = vmatpush3.msra.mxu1 %v792_v30 }
 0x1d9   : > { %1300 = vmatprep.subr.mxu1 %v1717_v0 }
 0x1da   : > { %1301 = vmatpush3.msra.mxu1 %v791_v31 }
 0x1db   : > { %1303 = vmatmul.mubr.msk.f32.vlgmr.msra.gmra.mxu1 %vm510_vm1, %v787_v22 }
 0x29b   : > { %v864_v37 = vpop.f32.mrf.mxu1 }
 0x29c   : > { %v869_v38 = vsel %vm617_vm2, %v864_v37, -inf }
 0x29d   : > { %870 = vmax.xlane.f32.xlu0 %v869_v38  ;;  %v1304_v39 = vpop.f32.mrf.mxu1 }
 0x326   : > { %v871_v40 = vpop.xlane.xlu0 %870 }
 0x327   : > { %v872_v41 = vsub.f32 %v864_v37, %v871_v40 }
 0x329   : > { %v873_v42 = vmul.f32 1.442695, %v872_v41 }
 0x32b   : > { %1422 = vpow2.f32 %v873_v42 }
 0x338   : > { %v1423_v43 = vpop.eup %1422 }
 0x339   : > { %v875_v44 = vsel %vm617_vm2, %v1423_v43, 0.0 }
 0x33a   : > { %876 = vadd.xlane.f32.xlu1 %v875_v44 }
 0x3c3   : > { %v877_v45 = vpop.xlane.xlu1 %876 }
 0x3c4   : > { %1424 = vrcp.f32 %v877_v45 }
 0x3d1   : > { %v1425_v46 = vpop.eup %1424 }
 0x3d2   : > { %v879_v47 = vmul.f32 %v1425_v46, %v1423_v43 }
 0x3d4   : > { %1308 = vmatmul.mubr.msk.f32.vlgmr.msra.gmra.mxu0 %vm617_vm2, %v879_v47  ;;  %955 = vst.msk [vmem:[%s493_s2] sm:$0xff] %vm617_vm2, %v879_v47 }
 0x3d5   : > { %1573 = shalt.err (!%p1570_p2)
}
 0x3d6   : > { %s1574_s16 = scalar_lea.hbm %s979_s27, 128  ;;  %s1578_s29 = scalar_lea.hbm %s2126_s8, 256 }
 0x3d7   : > { %p1575_p4 = scmp.ne.s32.totalorder %s979_s27, %s1574_s16  ;;  %p1579_p7 = scmp.lt.s32.totalorder %s979_s27, %s2126_s8 }
 0x3d8   : > { %p1580_p6 = scmp.lt.s32.totalorder %s1578_s29, %s1574_s16 }
 0x3d9   : > { %p1576_p1 = pnand %p1575_p4, %p1875_p5 }
 0x3da   : > { %p1581_p12 = por %p1580_p6, %p1579_p7 }
 0x3db   : > { %p1577_p8 = pneg %p1576_p1 }
 0x3dd   : > { %p1582_p0 = pnand %p1581_p12, %p1577_p8 }
 0x3df   : > { %1585 = shalt.err (!%p1582_p0)
}
 0x3e0   : > { %1326 = dma.vmem_to_hbm [thread:$0]  (%p1875_p5), %s982_s23, 128, %s979_s27, %s957_s11  }
 0x3e1   : > { %s486_s30 = scalar_lea.vmem [#allocation14], %s1923_s28  ;;  %s1009_s22 = sshll.u32 %s493_s2, 4  ;;  %s2044_s22 = int_to_ptr.vmem [resolvable:$true] %s1009_s22 }
 0x3e2   : > { %s995_s21 = sshll.u32 %s486_s30, 4  ;;  %s2034_s16 = scalar_lea.hbm %s2127_s9, %s2006_s20  ;;  %s2036_s21 = int_to_ptr.vmem [resolvable:$true] %s995_s21 }
 0x3e3   : > { %s2160_s29 = sld [smem:[#allocation30_spill]]  ;;  %s2049_s28 = scalar_lea.sflag [#allocation15], %s426_s6 }
 0x3e4   : > { %s1586_s2 = scalar_lea.vmem %s2036_s21, 128  ;;  %s1720_s27 = smov [#allocation14]  }
 0x3e5   : > { %p1587_p3 = scmp.ne.s32.totalorder %s2036_s21, %s1586_s2  ;;  %s1590_s23 = sshll.u32 %s1720_s27, 4  ;;  %s1591_s23 = int_to_ptr.vmem [resolvable:$false] %s1590_s23 }
 0x3e6   : > { %s1592_s11 = scalar_lea.vmem %s1591_s23, 256  ;;  %p1593_p9 = scmp.lt.s32.totalorder %s2036_s21, %s1591_s23 }
 0x3e7   : > { %p1588_p10 = pnand %p1587_p3, %p1875_p5  ;;  %p1594_p13 = scmp.lt.s32.totalorder %s1592_s11, %s1586_s2 }
 0x3e9   : > { %s2042_s12 = scalar_lea.hbm %s2160_s29, %s2006_s20  ;;  %p1589_p11 = pneg %p1588_p10 }
 0x3ea   : > { %p1595_p2 = por %p1594_p13, %p1593_p9 }
 0x3ec   : > { %p1596_p4 = pnand %p1595_p2, %p1589_p11 }
 0x494   : > { %v950_v48 = vpop.f32.mrf.mxu0 }
 0x495   : > { %954 = vst.msk [vmem:[%s486_s30] sm:$0xff] %vm510_vm1, %v950_v48 }
 0x496   : > { %v1309_v49 = vpop.f32.mrf.mxu0 }
 0x497   : > { %1599 = shalt.err (!%p1596_p4)
}
 0x498   : > { %s1600_s19 = scalar_lea.hbm %s2034_s16, 128  ;;  %s1604_s0 = scalar_lea.hbm %s2127_s9, 256 }
 0x499   : > { %p1601_p1 = scmp.ne.s32.totalorder %s2034_s16, %s1600_s19  ;;  %p1605_p6 = scmp.lt.s32.totalorder %s2034_s16, %s2127_s9 }
 0x49a   : > { %p1606_p12 = scmp.lt.s32.totalorder %s1604_s0, %s1600_s19 }
 0x49b   : > { %p1602_p8 = pnand %p1601_p1, %p1875_p5 }
 0x49c   : > { %p1607_p0 = por %p1606_p12, %p1605_p6 }
 0x49d   : > { %p1603_p7 = pneg %p1602_p8 }
 0x49f   : > { %p1608_p3 = pnand %p1607_p0, %p1603_p7 }
 0x4a1   : > { %1611 = shalt.err (!%p1608_p3)
}
 0x4a2   : > { %1327 = dma.vmem_to_hbm [thread:$0]  (%p1875_p5), %s2036_s21, 128, %s2034_s16, %s2049_s28  }
 0x4a3   : > { %s1612_s10 = scalar_lea.vmem %s2044_s22, 128  ;;  %s1721_s4 = smov [#allocation16]  }
 0x4a4   : > { %p1613_p10 = scmp.ne.s32.totalorder %s2044_s22, %s1612_s10  ;;  %s1616_s13 = sshll.u32 %s1721_s4, 4  ;;  %s1617_s13 = int_to_ptr.vmem [resolvable:$false] %s1616_s13 }
 0x4a5   : > { %s1618_s2 = scalar_lea.vmem %s1617_s13, 256  ;;  %p1619_p13 = scmp.lt.s32.totalorder %s2044_s22, %s1617_s13 }
 0x4a6   : > { %p1614_p11 = pnand %p1613_p10, %p1875_p5  ;;  %p1620_p2 = scmp.lt.s32.totalorder %s1618_s2, %s1612_s10 }
 0x4a8   : > { %p1615_p9 = pneg %p1614_p11  ;;  %p1621_p4 = por %p1620_p2, %p1619_p13 }
 0x4aa   : > { %p1622_p1 = pnand %p1621_p4, %p1615_p9 }
 0x4ac   : > { %1625 = shalt.err (!%p1622_p1)
}
 0x4ad   : > { %s1626_s27 = scalar_lea.hbm %s2042_s12, 128  ;;  %s1630_s23 = scalar_lea.hbm %s2160_s29, 256 }
 0x4ae   : > { %p1627_p8 = scmp.ne.s32.totalorder %s2042_s12, %s1626_s27  ;;  %p1631_p12 = scmp.lt.s32.totalorder %s2042_s12, %s2160_s29 }
 0x4af   : > { %p1632_p0 = scmp.lt.s32.totalorder %s1630_s23, %s1626_s27 }
 0x4b0   : > { %p1628_p7 = pnand %p1627_p8, %p1875_p5 }
 0x4b1   : > { %p1633_p3 = por %p1632_p0, %p1631_p12 }
 0x4b2   : > { %p1629_p6 = pneg %p1628_p7 }
 0x4b4   : > { %p1634_p10 = pnand %p1633_p3, %p1629_p6 }
 0x4b6   : > { %1637 = shalt.err (!%p1634_p10)
}
 0x4b7   : > { %1328 = dma.vmem_to_hbm [thread:$0]  (%p1875_p5), %s2044_s22, 128, %s2042_s12, %s2049_s28  }
 0x4b8 PF: > { %s2161_s6 = sld [smem:[#allocation23_spill]]  ;;  %p2164_p9 = scmp.ge.s32.totalorder %s1708_s18, 2 }
 0x4b9   : > { %s2162_s20 = sld [smem:[#allocation24_spill]] }
 0x4be   : > { %s1021_s0 = sand.u32 1, %s2161_s6  }
 0x4bf   : > { %p2163_p11 = scmp.ne.s32.totalorder %s2162_s20, 0  ;;  %s1022_s30 = scalar_lea.sflag [#allocation6], %s1021_s0 }
 0x4c1   : > { %p1350_p13 = pnand %p2164_p9, %p2163_p11 }
 0x4c3   : > { %p1351_p2 = pneg %p1350_p13 }
 0x4c5   : > { %1679 = dma.done.wait (%p1351_p2), %s1022_s30, 128  }
 0x4c6   : > { %1681 = vsyncadd (%p1351_p2), %s1022_s30, 4294967168  ;;  %s2165_s25 = sadd.s32 4294967294, %s1708_s18  }
 0x4c7   : > { %s1030_s10 = sand.u32 1, %s2165_s25  }
 0x4c8   : > { %s1031_s26 = scalar_lea.sflag [#allocation15], %s1030_s10 }
 0x4c9   : > { %1683 = dma.done.wait (%p1351_p2), %s1031_s26, 256  }
 0x4ca   : > { %1685 = vsyncadd (%p1351_p2), %s1031_s26, 4294967040  ;;  %s34_s18 = sadd.s32 1, %s1708_s18   ;;  %s2166_s22 = sld [smem:[#allocation25_spill]] }
 0x4cb   : > { %p31_p5 = scmp.ge.s32.totalorder %s34_s18, 4   ;;  %s2167_s13 = smov %s1692_s14 }
 0x4cc   : > { %s2168_s14 = smov %s1696_s15  ;;  %s2169_s15 = smov %s1887_s24 }
 0x4cd   : > { %s2170_s16 = smov %s1704_s17  ;;  %33 = sbr.rel (!%p31_p5) target bundleno = 17 (0x11), region = 158 }
 0x4d0   : > { %s2171_s17 = smov %s2166_s22 }
 0x4d2   :  { %1045 = vsyncpa [#allocation5], 1 }
 0x4d3   :  { %1047 = vsyncpa [#allocation5 + $0x1], 1 }
 0x4d4   :  { %1048 = vsyncpa [#allocation8], 1 }
 0x4d5   :  { %1050 = vsyncpa [#allocation8 + $0x1], 1 }
 0x4d6   :  { %1051 = vsyncpa [#allocation11], 1 }
 0x4d7   :  { %1052 = vsyncpa [#allocation6], 1 }
 0x4d8   :  { %1054 = vsyncpa [#allocation6 + $0x1], 1 }
 0x4d9   :  { %1055 = vsyncpa [#allocation15], 1 }
 0x4da   :  { %1057 = vsyncpa [#allocation15 + $0x1], 1 }

</bundles_post_ra>
